<compile_context>
chip_gen: v6e
topology: v6e:2x2x1
jax: 0.10.0
libtpu: 0.0.40
codegen_flags: <defaults>
</compile_context>

<pallas_src>
import math
from functools import partial

import numpy as np
import jax
import jax.numpy as jnp
from jax.experimental import pallas as pl
from jax.experimental.pallas import tpu as pltpu

LANE = 128


def _round_up(x, m):
    return (x + m - 1) // m * m


def _pad_to(a, shape):
    if tuple(a.shape) == tuple(shape):
        return a
    out = jnp.zeros(shape, a.dtype)
    return out.at[tuple(slice(0, s) for s in a.shape)].set(a)


# ----------------------------- Pallas kernel --------------------------------
def hybrid_kernel(xw_ref, g_ref, xd_ref,
                  bh_ref, wd_ref, bd_ref,
                  w1_ref, b1_ref, w2_ref, b2_ref,
                  out_ref, hd_ref):
    """Grid = (row_tiles, k_tiles); k = reduction over G's columns (arbitrary).

    xw_ref is the full [Np, HP] projection, resident in VMEM; G streams in
    (tm, tk) bf16 tiles. hd_ref is the fused f32 [h | d] accumulator scratch.
    """
    k = pl.program_id(1)
    hp = bh_ref.shape[1]                     # padded hgnn_output_dim (128)
    tk = g_ref.shape[1]                      # contraction tile width

    start = pl.multiple_of(k * tk, tk)
    xw_tile = xw_ref[pl.ds(start, tk), :]    # (tk, HP) bf16, sliced from resident xw

    prod = jnp.dot(g_ref[...], xw_tile, preferred_element_type=jnp.float32)

    # First reduction step writes directly (no zero-init store + read-modify-write).
    @pl.when(k == 0)
    def _():
        hd_ref[:, :hp] = prod

    @pl.when(k > 0)
    def _():
        hd_ref[:, :hp] += prod

    # --- epilogue on the last reduction step ---
    @pl.when(k == pl.num_programs(1) - 1)
    def _():
        # HGNN branch: bias + relu (f32)
        hd_ref[:, :hp] = jnp.maximum(hd_ref[:, :hp] + bh_ref[...], 0.0)
        # DNA branch: relu(one_hot_flat @ W_d + b_d), bf16 x bf16 -> f32
        d = jnp.dot(xd_ref[...], wd_ref[...],
                    preferred_element_type=jnp.float32) + bd_ref[...]
        hd_ref[:, hp:] = jnp.maximum(d, 0.0)
        # fusion head: cat([h, d]) @ W1 as ONE bf16 matmul with stacked W1
        hid = jnp.dot(hd_ref[...].astype(jnp.bfloat16), w1_ref[...],
                      preferred_element_type=jnp.float32) + b1_ref[...]
        hid = jnp.maximum(hid, 0.0)
        out_ref[...] = jnp.dot(hid.astype(jnp.bfloat16), w2_ref[...],
                               preferred_element_type=jnp.float32) + b2_ref[...]


# ------------------------------ wrapper (glue) -------------------------------
@partial(jax.jit, static_argnames=("num_classes", "tm", "tk"))
def hybrid_forward(x_hgnn, G, x_dna, params, num_classes, *, tm=512, tk=512):
    """x_dna: [N, S, 5] one-hot. params: padded (see make_params). -> [N, num_classes]."""
    N = x_hgnn.shape[0]

    HP = params["bh"].shape[1]
    DP = params["bd"].shape[1]
    HIDP = params["b1"].shape[1]
    CP = params["b2"].shape[1]
    SDP = params["wd"].shape[0]

    # Clamp tiles to (lane-aligned) N, then zero-pad N up to the tile grid.
    tm = min(tm, _round_up(N, LANE))
    tk = min(tk, _round_up(N, LANE))
    assert tm % 8 == 0 and tk % LANE == 0, "tm must be a multiple of 8, tk of 128"
    Np = _round_up(N, math.lcm(tm, tk))

    # Hoisted HGNN input projection (tiny [N, HP] product). Pinned resident in
    # VMEM below, so it is fetched exactly once.
    xw = jnp.dot(x_hgnn.astype(jnp.float32), params["wh"]).astype(jnp.bfloat16)
    xw_p = _pad_to(xw, (Np, HP))                                       # [Np, HP]

    # G arrives bf16 from generate_G_from_H; any residual cast / padding fuses
    # under jit (no standalone N^2 cast pass).
    g_p = _pad_to(G.astype(jnp.bfloat16), (Np, Np))                    # [Np, Np]

    # DNA branch input: flatten one-hot (already bf16), pad contraction to 128.
    xd_flat = x_dna.reshape(N, -1).astype(jnp.bfloat16)
    xd_p = _pad_to(xd_flat, (Np, SDP))                                 # [Np, SDP]

    args = (xw_p, g_p, xd_p,
            params["bh"], params["wd"], params["bd"],
            params["w1"], params["b1"], params["w2"], params["b2"])

    in_specs = [
        pl.BlockSpec((Np, HP), lambda i, k: (0, 0)),           # xw: fully resident
        pl.BlockSpec((tm, tk), lambda i, k: (i, k)),           # G: streamed tiles
        pl.BlockSpec((tm, SDP), lambda i, k: (i, 0)),          # one-hot DNA (padded)
        pl.BlockSpec((1, HP), lambda i, k: (0, 0)),            # bh
        pl.BlockSpec((SDP, DP), lambda i, k: (0, 0)),          # wd
        pl.BlockSpec((1, DP), lambda i, k: (0, 0)),            # bd
        pl.BlockSpec((HP + DP, HIDP), lambda i, k: (0, 0)),    # stacked W1
        pl.BlockSpec((1, HIDP), lambda i, k: (0, 0)),          # b1
        pl.BlockSpec((HIDP, CP), lambda i, k: (0, 0)),         # w2
        pl.BlockSpec((1, CP), lambda i, k: (0, 0)),            # b2
    ]

    out_pad = pl.pallas_call(
        hybrid_kernel,
        out_shape=jax.ShapeDtypeStruct((Np, CP), jnp.float32),
        grid=(Np // tm, Np // tk),
        in_specs=in_specs,
        out_specs=pl.BlockSpec((tm, CP), lambda i, k: (i, 0)),
        scratch_shapes=[pltpu.VMEM((tm, HP + DP), jnp.float32)],
        compiler_params=pltpu.CompilerParams(
            dimension_semantics=("parallel", "arbitrary"),
            vmem_limit_bytes=48 << 20),   # fits v7x's 64 MiB/TC; ample on v5e/v6e
    )(*args)

    return out_pad[:N, :num_classes]


# ----------------------------- parameter builder ------------------------------
def make_params(key, F_h, seq_onehot_dim, hgnn_out, dit_out, hidden, n_classes):
    k = jax.random.split(key, 7)
    w = lambda kk, shape, s=0.1: s * jax.random.normal(kk, shape, jnp.float32)

    HP = _round_up(hgnn_out, LANE)
    DP = _round_up(dit_out, LANE)
    HIDP = _round_up(hidden, LANE)
    CP = _round_up(n_classes, LANE)
    SDP = _round_up(seq_onehot_dim, LANE)

    wh = w(k[0], (F_h, hgnn_out))
    wd = w(k[1], (seq_onehot_dim, dit_out))
    w1h = w(k[2], (hgnn_out, hidden))
    w1d = w(k[3], (dit_out, hidden))
    b1 = w(k[4], (hidden,))
    w2 = w(k[5], (hidden, n_classes))
    b2 = w(k[6], (n_classes,))

    # Stacked fc1 weight: rows [0:hgnn_out] act on the h columns (0:HP of the
    # fused scratch), rows [HP:HP+dit_out] act on the d columns.
    w1_stacked = jnp.zeros((HP + DP, HIDP), jnp.float32)
    w1_stacked = w1_stacked.at[:hgnn_out, :hidden].set(w1h)
    w1_stacked = w1_stacked.at[HP:HP + dit_out, :hidden].set(w1d)

    return {
        "wh": _pad_to(wh, (F_h, HP)),                            # f32 (wrapper matmul)
        "bh": jnp.zeros((1, HP), jnp.float32),
        "wd": _pad_to(wd, (SDP, DP)).astype(jnp.bfloat16),
        "bd": jnp.zeros((1, DP), jnp.float32),
        "w1": w1_stacked.astype(jnp.bfloat16),
        "b1": _pad_to(b1[None, :], (1, HIDP)),
        "w2": _pad_to(w2, (HIDP, CP)).astype(jnp.bfloat16),
        "b2": _pad_to(b2[None, :], (1, CP)),
    }


# --------------------------- graph preprocessing -----------------------------
def build_incidence_matrix_from_labels(y):
    y = np.asarray(y)
    classes = np.unique(y)
    H = np.zeros((len(y), len(classes)), dtype=np.float32)
    for j, label in enumerate(classes):
        H[:, j] = (y == label).astype(np.float32)
    return H


def generate_G_from_H(H, *, dtype=jnp.bfloat16):
    # Safe reciprocal of the diagonal degree matrices (avoids inf/NaN on
    # zero-degree nodes / empty hyperedges). Emits bf16 directly so the kernel
    # doesn't pay a separate N^2 cast pass.
    H = jnp.asarray(H, dtype=jnp.float32)
    dv = jnp.sum(H, axis=1)
    de = jnp.sum(H, axis=0)
    dv_inv_sqrt = jnp.where(dv > 0, 1.0 / jnp.sqrt(dv), 0.0)
    de_inv = jnp.where(de > 0, 1.0 / de, 0.0)
    G = ((dv_inv_sqrt[:, None] * H) @ (de_inv[:, None] * H.T)) * dv_inv_sqrt[None, :]
    return G.astype(dtype)


# ----------------------------------- main ------------------------------------
if __name__ == "__main__":
    # Small but grid-able shapes consistent with the module.
    N = 512                # num genes (nodes)
    F_h = 8                # node-feature dim
    S = 8                  # DNA sequence length
    VOCAB = 5              # one-hot classes for DNA
    hgnn_output_dim = 8
    dit_output_dim = 8
    hidden_dim = 32
    num_classes = 3

    key = jax.random.PRNGKey(0)
    k_lab, k_feat, k_seq, k_par = jax.random.split(key, 4)

    # inputs
    expression_labels = jax.random.randint(k_lab, (N,), 0, num_classes)
    node_features = jax.random.normal(k_feat, (N, F_h), dtype=jnp.float32)
    sequence_data = jax.random.randint(k_seq, (N, S), 0, VOCAB)

    x_hgnn = node_features
    x_dna = jax.nn.one_hot(sequence_data, num_classes=VOCAB, dtype=jnp.bfloat16)  # [N,S,5]
    H = build_incidence_matrix_from_labels(np.asarray(expression_labels))
    G = generate_G_from_H(H)                                                      # [N,N] bf16

    params = make_params(k_par, F_h, S * VOCAB,
                         hgnn_output_dim, dit_output_dim, hidden_dim, num_classes)

    # Multi-tile grid (exercises the k-accumulation path and the 'parallel' row
    # axis across TensorCores) ...
    out_grid = jax.block_until_ready(
        hybrid_forward(x_hgnn, G, x_dna, params, num_classes=num_classes, tm=256, tk=256))
    # ... and the default big-tile configuration.
    out_big = jax.block_until_ready(
        hybrid_forward(x_hgnn, G, x_dna, params, num_classes=num_classes))

    # ---- pure-JAX reference (same bf16-rounded operands, f32 accumulation) ----
    f32 = lambda a: a.astype(jnp.float32)
    SDP = params["wd"].shape[0]
    xw_r = f32(jnp.dot(x_hgnn, params["wh"]).astype(jnp.bfloat16))
    h_r = jnp.maximum(f32(G.astype(jnp.bfloat16)) @ xw_r + params["bh"], 0.0)
    xd_r = _pad_to(f32(x_dna.reshape(N, -1)), (N, SDP))
    d_r = jnp.maximum(xd_r @ f32(params["wd"]) + params["bd"], 0.0)
    hd_r = f32(jnp.concatenate([h_r, d_r], axis=1).astype(jnp.bfloat16))
    hid_r = jnp.maximum(hd_r @ f32(params["w1"]) + params["b1"], 0.0)
    hid_r = f32(hid_r.astype(jnp.bfloat16))
    ref = (hid_r @ f32(params["w2"]) + params["b2"])[:, :num_classes]

    np.testing.assert_allclose(np.asarray(out_grid), np.asarray(ref), rtol=2e-3, atol=2e-3)
    np.testing.assert_allclose(np.asarray(out_big), np.asarray(ref), rtol=2e-3, atol=2e-3)
    assert out_grid.shape == (N, num_classes)
    assert out_big.shape == (N, num_classes)

    print("KERNEL_OK")
</pallas_src>

<mosaic_0001>
module attributes {stable_mosaic.version = 11 : i64} {
  func.func @hybrid_kernel(%arg0: i32, %arg1: i32, %arg2: memref<512x128xbf16, #tpu.memory_space<vmem>>, %arg3: memref<256x256xbf16, #tpu.memory_space<vmem>>, %arg4: memref<256x128xbf16, #tpu.memory_space<vmem>>, %arg5: memref<1x128xf32, #tpu.memory_space<vmem>>, %arg6: memref<128x128xbf16, #tpu.memory_space<vmem>>, %arg7: memref<1x128xf32, #tpu.memory_space<vmem>>, %arg8: memref<256x128xbf16, #tpu.memory_space<vmem>>, %arg9: memref<1x128xf32, #tpu.memory_space<vmem>>, %arg10: memref<128x128xbf16, #tpu.memory_space<vmem>>, %arg11: memref<1x128xf32, #tpu.memory_space<vmem>>, %arg12: memref<256x128xf32, #tpu.memory_space<vmem>>, %arg13: memref<256x256xf32, #tpu.memory_space<vmem>>) attributes {dimension_semantics = [#tpu.dimension_semantics<parallel>, #tpu.dimension_semantics<arbitrary>], iteration_bounds = array<i64: 2, 2>, scalar_prefetch = 0 : i64, scratch_operands = 1 : i64, tpu.core_type = #tpu.core_type<tc>, window_params = [{pipeline_mode = #tpu.pipeline_mode<synchronous>, transform_indices = @transform_0, window_bounds = array<i64: 512, 128>}, {transform_indices = @transform_1, window_bounds = array<i64: 256, 256>}, {transform_indices = @transform_2, window_bounds = array<i64: 256, 128>}, {pipeline_mode = #tpu.pipeline_mode<synchronous>, transform_indices = @transform_3, window_bounds = array<i64: 1, 128>}, {pipeline_mode = #tpu.pipeline_mode<synchronous>, transform_indices = @transform_4, window_bounds = array<i64: 128, 128>}, {pipeline_mode = #tpu.pipeline_mode<synchronous>, transform_indices = @transform_5, window_bounds = array<i64: 1, 128>}, {pipeline_mode = #tpu.pipeline_mode<synchronous>, transform_indices = @transform_6, window_bounds = array<i64: 256, 128>}, {pipeline_mode = #tpu.pipeline_mode<synchronous>, transform_indices = @transform_7, window_bounds = array<i64: 1, 128>}, {pipeline_mode = #tpu.pipeline_mode<synchronous>, transform_indices = @transform_8, window_bounds = array<i64: 128, 128>}, {pipeline_mode = #tpu.pipeline_mode<synchronous>, transform_indices = @transform_9, window_bounds = array<i64: 1, 128>}, {transform_indices = @transform_10, window_bounds = array<i64: 256, 128>}]} {
    %c256_i32 = arith.constant 256 : i32
    %0 = arith.muli %arg1, %c256_i32 : i32
    %1 = tpu.assume_multiple %0, 256 : i32
    %2 = arith.index_cast %1 : i32 to index
    %c0 = arith.constant 0 : index
    %3 = vector.load %arg2[%2, %c0] : memref<512x128xbf16, #tpu.memory_space<vmem>>, vector<256x128xbf16>
    %c0_0 = arith.constant 0 : index
    %c0_1 = arith.constant 0 : index
    %4 = vector.load %arg3[%c0_0, %c0_1] : memref<256x256xbf16, #tpu.memory_space<vmem>>, vector<256x256xbf16>
    %cst = arith.constant dense<0.000000e+00> : vector<256x128xf32>
    %5 = tpu.matmul %4, %3, %cst {dimension_numbers = #tpu.dot_dimension_numbers<[1], [0], [0], [1], [0, 0, 1, 1], [], []>} : vector<256x256xbf16>, vector<256x128xbf16>, vector<256x128xf32> -> vector<256x128xf32>
    %c0_i32 = arith.constant 0 : i32
    %6 = arith.cmpi eq, %arg1, %c0_i32 : i32
    %7 = arith.extui %6 : i1 to i32
    %c0_i32_2 = arith.constant 0 : i32
    %8 = arith.cmpi ne, %7, %c0_i32_2 : i32
    scf.if %8 {
      %c0_6 = arith.constant 0 : index
      %c0_7 = arith.constant 0 : index
      %15 = vector.load %arg13[%c0_6, %c0_7] : memref<256x256xf32, #tpu.memory_space<vmem>>, vector<256x128xf32>
      tpu.vector_store %arg13[%c0_6, %c0_7], %5 {strides = array<i32>} : memref<256x256xf32, #tpu.memory_space<vmem>>, vector<256x128xf32>,
    } else {
    }
    %c0_i32_3 = arith.constant 0 : i32
    %9 = arith.cmpi sgt, %arg1, %c0_i32_3 : i32
    %10 = arith.extui %9 : i1 to i32
    %c0_i32_4 = arith.constant 0 : i32
    %11 = arith.cmpi ne, %10, %c0_i32_4 : i32
    scf.if %11 {
      %c0_6 = arith.constant 0 : index
      %c0_7 = arith.constant 0 : index
      %15 = vector.load %arg13[%c0_6, %c0_7] : memref<256x256xf32, #tpu.memory_space<vmem>>, vector<256x128xf32>
      %16 = arith.addf %15, %5 : vector<256x128xf32>
      %c0_8 = arith.constant 0 : index
      %c0_9 = arith.constant 0 : index
      %17 = vector.load %arg13[%c0_8, %c0_9] : memref<256x256xf32, #tpu.memory_space<vmem>>, vector<256x128xf32>
      tpu.vector_store %arg13[%c0_8, %c0_9], %16 {strides = array<i32>} : memref<256x256xf32, #tpu.memory_space<vmem>>, vector<256x128xf32>,
    } else {
    }
    %c1_i32 = arith.constant 1 : i32
    %12 = arith.cmpi eq, %arg1, %c1_i32 : i32
    %13 = arith.extui %12 : i1 to i32
    %c0_i32_5 = arith.constant 0 : i32
    %14 = arith.cmpi ne, %13, %c0_i32_5 : i32
    scf.if %14 {
      %c0_6 = arith.constant 0 : index
      %c0_7 = arith.constant 0 : index
      %15 = vector.load %arg13[%c0_6, %c0_7] : memref<256x256xf32, #tpu.memory_space<vmem>>, vector<256x128xf32>
      %c0_8 = arith.constant 0 : index
      %c0_9 = arith.constant 0 : index
      %16 = vector.load %arg5[%c0_8, %c0_9] : memref<1x128xf32, #tpu.memory_space<vmem>>, vector<1x128xf32>
      %17 = vector.broadcast %16 : vector<1x128xf32> to vector<256x128xf32>
      %18 = arith.addf %15, %17 : vector<256x128xf32>
      %cst_10 = arith.constant 0.000000e+00 : f32
      %19 = vector.broadcast %cst_10 : f32 to vector<256x128xf32>
      %20 = arith.maximumf %18, %19 : vector<256x128xf32>
      %c0_11 = arith.constant 0 : index
      %c0_12 = arith.constant 0 : index
      %21 = vector.load %arg13[%c0_11, %c0_12] : memref<256x256xf32, #tpu.memory_space<vmem>>, vector<256x128xf32>
      tpu.vector_store %arg13[%c0_11, %c0_12], %20 {strides = array<i32>} : memref<256x256xf32, #tpu.memory_space<vmem>>, vector<256x128xf32>,
      %c0_13 = arith.constant 0 : index
      %c0_14 = arith.constant 0 : index
      %22 = vector.load %arg4[%c0_13, %c0_14] : memref<256x128xbf16, #tpu.memory_space<vmem>>, vector<256x128xbf16>
      %c0_15 = arith.constant 0 : index
      %c0_16 = arith.constant 0 : index
      %23 = vector.load %arg6[%c0_15, %c0_16] : memref<128x128xbf16, #tpu.memory_space<vmem>>, vector<128x128xbf16>
      %cst_17 = arith.constant dense<0.000000e+00> : vector<256x128xf32>
      %24 = tpu.matmul %22, %23, %cst_17 {dimension_numbers = #tpu.dot_dimension_numbers<[1], [0], [0], [1], [0, 0, 1, 1], [], []>} : vector<256x128xbf16>, vector<128x128xbf16>, vector<256x128xf32> -> vector<256x128xf32>
      %c0_18 = arith.constant 0 : index
      %c0_19 = arith.constant 0 : index
      %25 = vector.load %arg7[%c0_18, %c0_19] : memref<1x128xf32, #tpu.memory_space<vmem>>, vector<1x128xf32>
      %26 = vector.broadcast %25 : vector<1x128xf32> to vector<256x128xf32>
      %27 = arith.addf %24, %26 : vector<256x128xf32>
      %cst_20 = arith.constant 0.000000e+00 : f32
      %28 = vector.broadcast %cst_20 : f32 to vector<256x128xf32>
      %29 = arith.maximumf %27, %28 : vector<256x128xf32>
      %c0_21 = arith.constant 0 : index
      %c128 = arith.constant 128 : index
      %30 = vector.load %arg13[%c0_21, %c128] : memref<256x256xf32, #tpu.memory_space<vmem>>, vector<256x128xf32>
      tpu.vector_store %arg13[%c0_21, %c128], %29 {strides = array<i32>} : memref<256x256xf32, #tpu.memory_space<vmem>>, vector<256x128xf32>,
      %c0_22 = arith.constant 0 : index
      %c0_23 = arith.constant 0 : index
      %31 = vector.load %arg13[%c0_22, %c0_23] : memref<256x256xf32, #tpu.memory_space<vmem>>, vector<256x256xf32>
      %32 = arith.truncf %31 : vector<256x256xf32> to vector<256x256xbf16>
      %c0_24 = arith.constant 0 : index
      %c0_25 = arith.constant 0 : index
      %33 = vector.load %arg8[%c0_24, %c0_25] : memref<256x128xbf16, #tpu.memory_space<vmem>>, vector<256x128xbf16>
      %cst_26 = arith.constant dense<0.000000e+00> : vector<256x128xf32>
      %34 = tpu.matmul %32, %33, %cst_26 {dimension_numbers = #tpu.dot_dimension_numbers<[1], [0], [0], [1], [0, 0, 1, 1], [], []>} : vector<256x256xbf16>, vector<256x128xbf16>, vector<256x128xf32> -> vector<256x128xf32>
      %c0_27 = arith.constant 0 : index
      %c0_28 = arith.constant 0 : index
      %35 = vector.load %arg9[%c0_27, %c0_28] : memref<1x128xf32, #tpu.memory_space<vmem>>, vector<1x128xf32>
      %36 = vector.broadcast %35 : vector<1x128xf32> to vector<256x128xf32>
      %37 = arith.addf %34, %36 : vector<256x128xf32>
      %cst_29 = arith.constant 0.000000e+00 : f32
      %38 = vector.broadcast %cst_29 : f32 to vector<256x128xf32>
      %39 = arith.maximumf %37, %38 : vector<256x128xf32>
      %40 = arith.truncf %39 : vector<256x128xf32> to vector<256x128xbf16>
      %c0_30 = arith.constant 0 : index
      %c0_31 = arith.constant 0 : index
      %41 = vector.load %arg10[%c0_30, %c0_31] : memref<128x128xbf16, #tpu.memory_space<vmem>>, vector<128x128xbf16>
      %cst_32 = arith.constant dense<0.000000e+00> : vector<256x128xf32>
      %42 = tpu.matmul %40, %41, %cst_32 {dimension_numbers = #tpu.dot_dimension_numbers<[1], [0], [0], [1], [0, 0, 1, 1], [], []>} : vector<256x128xbf16>, vector<128x128xbf16>, vector<256x128xf32> -> vector<256x128xf32>
      %c0_33 = arith.constant 0 : index
      %c0_34 = arith.constant 0 : index
      %43 = vector.load %arg11[%c0_33, %c0_34] : memref<1x128xf32, #tpu.memory_space<vmem>>, vector<1x128xf32>
      %44 = vector.broadcast %43 : vector<1x128xf32> to vector<256x128xf32>
      %45 = arith.addf %42, %44 : vector<256x128xf32>
      %c0_35 = arith.constant 0 : index
      %c0_36 = arith.constant 0 : index
      %46 = vector.load %arg12[%c0_35, %c0_36] : memref<256x128xf32, #tpu.memory_space<vmem>>, vector<256x128xf32>
      tpu.vector_store %arg12[%c0_35, %c0_36], %45 {strides = array<i32>} : memref<256x128xf32, #tpu.memory_space<vmem>>, vector<256x128xf32>,
    } else {
    }
    return
  }
  func.func @transform_0(%arg0: i32, %arg1: i32) -> (i32, i32) {
    %c0_i32 = arith.constant 0 : i32
    %c0_i32_0 = arith.constant 0 : i32
    %c0_i32_1 = arith.constant 0 : i32
    return %c0_i32, %c0_i32_0 : i32, i32
  }
  func.func @transform_1(%arg0: i32, %arg1: i32) -> (i32, i32) {
    %c0_i32 = arith.constant 0 : i32
    return %arg0, %arg1 : i32, i32
  }
  func.func @transform_2(%arg0: i32, %arg1: i32) -> (i32, i32) {
    %c0_i32 = arith.constant 0 : i32
    %c0_i32_0 = arith.constant 0 : i32
    return %arg0, %c0_i32 : i32, i32
  }
  func.func @transform_3(%arg0: i32, %arg1: i32) -> (i32, i32) {
    %c0_i32 = arith.constant 0 : i32
    %c0_i32_0 = arith.constant 0 : i32
    %c0_i32_1 = arith.constant 0 : i32
    return %c0_i32, %c0_i32_0 : i32, i32
  }
  func.func @transform_4(%arg0: i32, %arg1: i32) -> (i32, i32) {
    %c0_i32 = arith.constant 0 : i32
    %c0_i32_0 = arith.constant 0 : i32
    %c0_i32_1 = arith.constant 0 : i32
    return %c0_i32, %c0_i32_0 : i32, i32
  }
  func.func @transform_5(%arg0: i32, %arg1: i32) -> (i32, i32) {
    %c0_i32 = arith.constant 0 : i32
    %c0_i32_0 = arith.constant 0 : i32
    %c0_i32_1 = arith.constant 0 : i32
    return %c0_i32, %c0_i32_0 : i32, i32
  }
  func.func @transform_6(%arg0: i32, %arg1: i32) -> (i32, i32) {
    %c0_i32 = arith.constant 0 : i32
    %c0_i32_0 = arith.constant 0 : i32
    %c0_i32_1 = arith.constant 0 : i32
    return %c0_i32, %c0_i32_0 : i32, i32
  }
  func.func @transform_7(%arg0: i32, %arg1: i32) -> (i32, i32) {
    %c0_i32 = arith.constant 0 : i32
    %c0_i32_0 = arith.constant 0 : i32
    %c0_i32_1 = arith.constant 0 : i32
    return %c0_i32, %c0_i32_0 : i32, i32
  }
  func.func @transform_8(%arg0: i32, %arg1: i32) -> (i32, i32) {
    %c0_i32 = arith.constant 0 : i32
    %c0_i32_0 = arith.constant 0 : i32
    %c0_i32_1 = arith.constant 0 : i32
    return %c0_i32, %c0_i32_0 : i32, i32
  }
  func.func @transform_9(%arg0: i32, %arg1: i32) -> (i32, i32) {
    %c0_i32 = arith.constant 0 : i32
    %c0_i32_0 = arith.constant 0 : i32
    %c0_i32_1 = arith.constant 0 : i32
    return %c0_i32, %c0_i32_0 : i32, i32
  }
  func.func @transform_10(%arg0: i32, %arg1: i32) -> (i32, i32) {
    %c0_i32 = arith.constant 0 : i32
    %c0_i32_0 = arith.constant 0 : i32
    return %arg0, %c0_i32 : i32, i32
  }
}

</mosaic_0001>

<bundles_post_ra>
// kernel: hybrid_forward.1
= control target key start
LH: loop header
LB: loop body
LE: loop exit
PB: predicated region body
PF: predicated region fallthrough
CT: control target
= control target key end

     0   :  { %s3329_s13 = smov 0   ;;  %s3331_s14 = smov 0   ;;  %s4030_s0 = inlined_call_operand.vmem [shape: bf16[512,128], index: 0, kind: input, shape index: {}]   ;;  %s4031_s1 = inlined_call_operand.vmem [shape: bf16[512,512], index: 1, kind: input, shape index: {}]   ;;  %s4032_s2 = inlined_call_operand.vmem [shape: bf16[512,128], index: 2, kind: input, shape index: {}]   ;;  %s4033_s3 = inlined_call_operand.vmem [shape: f32[1,128], index: 3, kind: input, shape index: {}]   ;;  %s4034_s4 = inlined_call_operand.vmem [shape: bf16[128,128], index: 4, kind: input, shape index: {}]   ;;  %s4035_s5 = inlined_call_operand.vmem [shape: f32[1,128], index: 5, kind: input, shape index: {}]   ;;  %s4036_s6 = inlined_call_operand.vmem [shape: bf16[256,128], index: 6, kind: input, shape index: {}]   ;;  %s4037_s7 = inlined_call_operand.vmem [shape: f32[1,128], index: 7, kind: input, shape index: {}]   ;;  %s4038_s8 = inlined_call_operand.vmem [shape: bf16[128,128], index: 8, kind: input, shape index: {}]   ;;  %s4039_s9 = inlined_call_operand.vmem [shape: f32[1,128], index: 9, kind: input, shape index: {}]   ;;  %s4040_s10 = inlined_call_operand.vmem [shape: f32[512,128], index: 10, kind: output, shape index: {}]  }
   0x1   :  { %s3333_s15 = smov 0   ;;  %s3335_s16 = smov 0  }
   0x2   :  { %s3337_s17 = smov 0   ;;  %s3339_s18 = smov 0  }
   0x3   :  { %s3341_s19 = smov 0  }
   0x4 LB: > { %s29_s20 = sadd.s32 1, %s3264_s17  ;;  %s32_s21 = sadd.s32 1, %s3268_s18  ;;  %s3272_s19 = sphi %s3341_s19, %s20_s19   ;;  %s3268_s18 = sphi %s3339_s18, %s4052_s18   ;;  %s3264_s17 = sphi %s3337_s17, %s4051_s17   ;;  %s3260_s16 = sphi %s3335_s16, %s4050_s16   ;;  %s3256_s15 = sphi %s3333_s15, %s4049_s15   ;;  %s3252_s14 = sphi %s3331_s14, %s4048_s14   ;;  %s3248_s13 = sphi %s3329_s13, %s4047_s13  }
   0x5   : > { %p30_p0 = scmp.ge.s32.totalorder %s29_s20, 2  ;;  %p69_p1 = scmp.ne.s32.totalorder %s3252_s14, %s3248_s13 }
   0x6   : > { %p70_p2 = scmp.eq.s32.totalorder %s3272_s19, 0  ;;  %s62_s25 = sadd.s32 1, %s3252_s14 }
   0x7   : > { %s4054_s20 = smov (%p30_p0, %s29_s20), 0  ;;  %s4056_s21 = smov (!%p30_p0, %s32_s21), %s3268_s18 }
   0x8   : > { %4043 = sst [smem:[#allocation4_spill]] %s4054_s20  ;;  %p71_p3 = por %p70_p2, %p69_p1 }
   0x9   : > { %p34_p4 = scmp.ge.s32.totalorder %s4056_s21, 2  ;;  %s58_s22 = ssub.s32 %s3264_s17, %s4054_s20 }
   0xa   : > { %p2546_p6 = scmp.ge.s32.totalorder %s3272_s19, 4 }
   0xb   : > { %s4058_s21 = smov (%p34_p4, %s4056_s21), 0 }
   0xc   : > { %4044 = sst [smem:[#allocation5_spill]] %s4058_s21  ;;  %s57_s23 = ssub.s32 %s3268_s18, %s4058_s21 }
   0xd   : > { %s59_s24 = sor.u32 %s58_s22, %s57_s23  ;;  %318 = sbr.rel (%p2546_p6) target bundleno = 41 (0x29), region = 48 }
   0xe   : > { %p60_p5 = scmp.eq.s32.totalorder %s59_s24, 0 }
  0x10   : > { %s3380_s26 = scalar_select %p60_p5, %s3252_s14, %s62_s25  }
  0x12   : > { %321 = sbr.rel (!%p71_p3) target bundleno = 41 (0x29), region = 52  ;;  %s323_s27 = sand.u32 (%p71_p3), 1, %s3252_s14  }
  0x13   : > { %s2549_s28 = sshll.u32 (%p71_p3), %s3264_s17, 1  ;;  %s2547_s29 = sshll.u32 (%p71_p3), %s323_s27, 8 }
  0x14   : > { %s2665_s30 = sshll.u32 (%p71_p3), %s3268_s18, 7  ;;  %s3394_s23 = scalar_lea.vmem (%p71_p3), [#allocation3], %s2547_s29 }
  0x15   : > { %s329_s11 = sadd.s32 (%p71_p3), %s2665_s30, %s2549_s28 }
  0x16   : > { %s2551_s12 = sshll.u32 (%p71_p3), %s329_s11, 2 }
  0x17   : > { %s3389_s22 = scalar_lea.vmem %s4031_s1, %s2551_s12 }
  0x18   : > { %v422_v0 = vld [vmem:[%s3389_s22] sm:$0xff]  ;;  %v424_v1 = vld [vmem:[%s3389_s22 + $0x10] sm:$0xff] }
  0x19   : > { %v426_v2 = vld [vmem:[%s3389_s22 + $0x20] sm:$0xff]  ;;  %423 = vst [vmem:[%s3394_s23] sm:$0xff] %v422_v0  ;;  %425 = vst [vmem:[%s3394_s23 + $0x8] sm:$0xff] %v424_v1  ;;  %v428_v3 = vld [vmem:[%s3389_s22 + $0x30] sm:$0xff] }
  0x1a   : > { %427 = vst [vmem:[%s3394_s23 + $0x10] sm:$0xff] %v426_v2  ;;  %v430_v4 = vld [vmem:[%s3389_s22 + $0x40] sm:$0xff]  ;;  %v432_v5 = vld [vmem:[%s3389_s22 + $0x50] sm:$0xff]  ;;  %429 = vst [vmem:[%s3394_s23 + $0x18] sm:$0xff] %v428_v3 }
  0x1b   : > { %431 = vst [vmem:[%s3394_s23 + $0x20] sm:$0xff] %v430_v4  ;;  %433 = vst [vmem:[%s3394_s23 + $0x28] sm:$0xff] %v432_v5  ;;  %v434_v6 = vld [vmem:[%s3389_s22 + $0x60] sm:$0xff]  ;;  %v436_v7 = vld [vmem:[%s3389_s22 + $0x70] sm:$0xff] }
  0x1c   : > { %v438_v8 = vld [vmem:[%s3389_s22 + $0x80] sm:$0xff]  ;;  %435 = vst [vmem:[%s3394_s23 + $0x30] sm:$0xff] %v434_v6  ;;  %437 = vst [vmem:[%s3394_s23 + $0x38] sm:$0xff] %v436_v7  ;;  %v440_v9 = vld [vmem:[%s3389_s22 + $0x90] sm:$0xff] }
  0x1d   : > { %439 = vst [vmem:[%s3394_s23 + $0x40] sm:$0xff] %v438_v8  ;;  %v442_v10 = vld [vmem:[%s3389_s22 + $0xa0] sm:$0xff]  ;;  %v444_v11 = vld [vmem:[%s3389_s22 + $0xb0] sm:$0xff]  ;;  %441 = vst [vmem:[%s3394_s23 + $0x48] sm:$0xff] %v440_v9 }
  0x1e   : > { %443 = vst [vmem:[%s3394_s23 + $0x50] sm:$0xff] %v442_v10  ;;  %445 = vst [vmem:[%s3394_s23 + $0x58] sm:$0xff] %v444_v11  ;;  %v446_v12 = vld [vmem:[%s3389_s22 + $0xc0] sm:$0xff]  ;;  %v448_v13 = vld [vmem:[%s3389_s22 + $0xd0] sm:$0xff] }
  0x1f   : > { %v450_v14 = vld [vmem:[%s3389_s22 + $0xe0] sm:$0xff]  ;;  %447 = vst [vmem:[%s3394_s23 + $0x60] sm:$0xff] %v446_v12  ;;  %449 = vst [vmem:[%s3394_s23 + $0x68] sm:$0xff] %v448_v13  ;;  %v452_v15 = vld [vmem:[%s3389_s22 + $0xf0] sm:$0xff] }
  0x20   : > { %451 = vst [vmem:[%s3394_s23 + $0x70] sm:$0xff] %v450_v14  ;;  %v454_v16 = vld [vmem:[%s3389_s22 + $0x100] sm:$0xff]  ;;  %v456_v17 = vld [vmem:[%s3389_s22 + $0x110] sm:$0xff]  ;;  %453 = vst [vmem:[%s3394_s23 + $0x78] sm:$0xff] %v452_v15 }
  0x21   : > { %455 = vst [vmem:[%s3394_s23 + $0x80] sm:$0xff] %v454_v16  ;;  %457 = vst [vmem:[%s3394_s23 + $0x88] sm:$0xff] %v456_v17  ;;  %v458_v18 = vld [vmem:[%s3389_s22 + $0x120] sm:$0xff]  ;;  %v460_v19 = vld [vmem:[%s3389_s22 + $0x130] sm:$0xff] }
  0x22   : > { %v462_v20 = vld [vmem:[%s3389_s22 + $0x140] sm:$0xff]  ;;  %459 = vst [vmem:[%s3394_s23 + $0x90] sm:$0xff] %v458_v18  ;;  %461 = vst [vmem:[%s3394_s23 + $0x98] sm:$0xff] %v460_v19  ;;  %v464_v21 = vld [vmem:[%s3389_s22 + $0x150] sm:$0xff] }
  0x23   : > { %463 = vst [vmem:[%s3394_s23 + $0xa0] sm:$0xff] %v462_v20  ;;  %v466_v22 = vld [vmem:[%s3389_s22 + $0x160] sm:$0xff]  ;;  %v468_v23 = vld [vmem:[%s3389_s22 + $0x170] sm:$0xff]  ;;  %465 = vst [vmem:[%s3394_s23 + $0xa8] sm:$0xff] %v464_v21 }
  0x24   : > { %467 = vst [vmem:[%s3394_s23 + $0xb0] sm:$0xff] %v466_v22  ;;  %469 = vst [vmem:[%s3394_s23 + $0xb8] sm:$0xff] %v468_v23  ;;  %v470_v24 = vld [vmem:[%s3389_s22 + $0x180] sm:$0xff]  ;;  %v472_v25 = vld [vmem:[%s3389_s22 + $0x190] sm:$0xff] }
  0x25   : > { %v474_v26 = vld [vmem:[%s3389_s22 + $0x1a0] sm:$0xff]  ;;  %471 = vst [vmem:[%s3394_s23 + $0xc0] sm:$0xff] %v470_v24  ;;  %473 = vst [vmem:[%s3394_s23 + $0xc8] sm:$0xff] %v472_v25  ;;  %v476_v27 = vld [vmem:[%s3389_s22 + $0x1b0] sm:$0xff] }
  0x26   : > { %475 = vst [vmem:[%s3394_s23 + $0xd0] sm:$0xff] %v474_v26  ;;  %v478_v28 = vld [vmem:[%s3389_s22 + $0x1c0] sm:$0xff]  ;;  %v480_v29 = vld [vmem:[%s3389_s22 + $0x1d0] sm:$0xff]  ;;  %477 = vst [vmem:[%s3394_s23 + $0xd8] sm:$0xff] %v476_v27 }
  0x27   : > { %479 = vst [vmem:[%s3394_s23 + $0xe0] sm:$0xff] %v478_v28  ;;  %481 = vst [vmem:[%s3394_s23 + $0xe8] sm:$0xff] %v480_v29  ;;  %v482_v30 = vld [vmem:[%s3389_s22 + $0x1e0] sm:$0xff]  ;;  %v484_v31 = vld [vmem:[%s3389_s22 + $0x1f0] sm:$0xff] }
  0x28   : > { %483 = vst [vmem:[%s3394_s23 + $0xf0] sm:$0xff] %v482_v30  ;;  %485 = vst [vmem:[%s3394_s23 + $0xf8] sm:$0xff] %v484_v31 }
  0x29 PF: > { %p2552_p7 = scmp.ge.s32.totalorder %s3272_s19, 1  ;;  %p499_p8 = scmp.lt.s32.totalorder %s3272_s19, 5 }
  0x2b   : > { %p500_p9 = pnand %p2552_p7, %p499_p8 }
  0x2c   : > { %s2554_s20 = sshll.u32 (!%p500_p9), %s3260_s16, 5  ;;  %s2558_s21 = sshll.u32 (!%p500_p9), %s3256_s15, 8 }
  0x2d   : > { %503 = sbr.rel (%p500_p9) target bundleno = 1156 (0x484), region = 94  ;;  %p551_p10 = scmp.lt.s32.totalorder (!%p500_p9), %s2554_s20, 63 }
  0x2e   : > { %s564_s24 = sshra.s32 (!%p500_p9), %s2558_s21, 3  ;;  %p2608_p11 = scmp.ne.s32.totalorder (!%p500_p9), %s3256_s15, 0 }
  0x2f   : > { %s2559_s25 = sshll.u32 (!%p500_p9), %s564_s24, 2 }
  0x30   : > { %s3464_s29 = scalar_lea.vmem (!%p500_p9), %s4030_s0, %s2559_s25 }
  0x32   : > { %s4060_s20 = smov (!%p551_p10, %s2554_s20), 63  ;;  %v3106_v32 = vld [vmem:[%s3464_s29 + $0x78] sm:$0xff]   ;;  %v3108_v34 = vld [vmem:[%s3464_s29 + $0x70] sm:$0xff]   ;;  %v3110_v36 = vld [vmem:[%s3464_s29 + $0x68] sm:$0xff]  }
  0x33   : > { %s2555_s30 = sshll.u32 %s4060_s20, 2  ;;  %s2557_s11 = sshll.u32 %s4060_s20, 3  ;;  %v3107_v33 = vld [vmem:[%s3464_s29 + $0x38] sm:$0xff]   ;;  %2666 = vmatprep.subr.bf16.mxu0 %v3106_v32  ;;  %3034 = vmatprep.subr.bf16.mxu1 %v3106_v32  ;;  %v3109_v35 = vld [vmem:[%s3464_s29 + $0x30] sm:$0xff]   ;;  %v3111_v37 = vld [vmem:[%s3464_s29 + $0x28] sm:$0xff]  }
  0x34   : > { %s3469_s16 = scalar_lea.vmem %s4032_s2, %s2555_s30  ;;  %s3474_s24 = scalar_lea.vmem %s4040_s10, %s2557_s11  ;;  %2667 = vmatpush3.bf16.msra.mxu0 %v3107_v33  ;;  %3042 = vmatpush3.bf16.msra.mxu1 %v3107_v33  ;;  %v3112_v38 = vld [vmem:[%s3464_s29 + $0x60] sm:$0xff]   ;;  %v3114_v40 = vld [vmem:[%s3464_s29 + $0x58] sm:$0xff]   ;;  %v3116_v42 = vld [vmem:[%s3464_s29 + $0x50] sm:$0xff]  }
  0x35   : > { %2668 = vmatprep.subr.bf16.mxu0 %v3108_v34  ;;  %3035 = vmatprep.subr.bf16.mxu1 %v3108_v34  ;;  %s506_s20 = sand.u32 1, %s3248_s13   ;;  %v3113_v39 = vld [vmem:[%s3464_s29 + $0x20] sm:$0xff]   ;;  %v3115_v41 = vld [vmem:[%s3464_s29 + $0x18] sm:$0xff]   ;;  %v3117_v45 = vld [vmem:[%s3464_s29 + $0x10] sm:$0xff]  }
  0x36   : > { %s2553_s25 = sshll.u32 %s506_s20, 8  ;;  %v3118_v46 = vld [vmem:[%s3464_s29 + $0x48] sm:$0xff]   ;;  %v3120_v48 = vld [vmem:[%s3464_s29 + $0x40] sm:$0xff]  }
  0x37   : > { %s3487_s27 = scalar_lea.vmem [#allocation3], %s2553_s25  ;;  %v3119_v47 = vld [vmem:[%s3464_s29 + $0x8] sm:$0xff]   ;;  %v3121_v49 = vld [vmem:[%s3464_s29] sm:$0xff]  }
  0x38   : > { %2669 = vmatpush3.bf16.msra.mxu0 %v3109_v35  ;;  %3043 = vmatpush3.bf16.msra.mxu1 %v3109_v35  ;;  %v3124_v43 = vld [vmem:[%s3487_s27 + $0x4] ss:$8 sps:$4 sm:$0xff]   ;;  %v3122_v50 = vld [vmem:[%s3487_s27] ss:$8 sps:$4 sm:$0xff]   ;;  %v3128_v52 = vld [vmem:[%s3487_s27 + $0x14] ss:$8 sps:$4 sm:$0xff]  }
  0x39   : > { %2670 = vmatprep.subr.bf16.mxu0 %v3110_v36  ;;  %3036 = vmatprep.subr.bf16.mxu1 %v3110_v36  ;;  %v3127_v44 = vld [vmem:[%s3487_s27 + $0x84] ss:$8 sps:$4 sm:$0xff]   ;;  %v3125_v51 = vld [vmem:[%s3487_s27 + $0x80] ss:$8 sps:$4 sm:$0xff]   ;;  %v3130_v53 = vld [vmem:[%s3487_s27 + $0x94] ss:$8 sps:$4 sm:$0xff]  }
  0x3a   : > { %920 = vmatprep.mubr.bf16.mxu0 %v3124_v43  ;;  %984 = vmatprep.mubr.bf16.mxu1 %v3127_v44  ;;  %v3132_v54 = vld [vmem:[%s3487_s27 + $0x10] ss:$8 sps:$4 sm:$0xff]   ;;  %v3134_v56 = vld [vmem:[%s3487_s27 + $0x24] ss:$8 sps:$4 sm:$0xff]   ;;  %v3138_v58 = vld [vmem:[%s3487_s27 + $0x20] ss:$8 sps:$4 sm:$0xff]  }
  0x3b   : > { %v3133_v55 = vld [vmem:[%s3487_s27 + $0x90] ss:$8 sps:$4 sm:$0xff]   ;;  %v3136_v57 = vld [vmem:[%s3487_s27 + $0xa4] ss:$8 sps:$4 sm:$0xff]   ;;  %v3139_v59 = vld [vmem:[%s3487_s27 + $0xa0] ss:$8 sps:$4 sm:$0xff]  }
  0x3c   : > { %2671 = vmatpush3.bf16.msra.mxu0 %v3111_v37  ;;  %3044 = vmatpush3.bf16.msra.mxu1 %v3111_v37  ;;  %v3140_v60 = vld [vmem:[%s3487_s27 + $0x34] ss:$8 sps:$4 sm:$0xff]   ;;  %v3144_v62 = vld [vmem:[%s3487_s27 + $0x30] ss:$8 sps:$4 sm:$0xff]   ;;  %v3146_v0 = vld [vmem:[%s3487_s27 + $0x44] ss:$8 sps:$4 sm:$0xff]  }
  0x3d   : > { %2672 = vmatprep.subr.bf16.mxu0 %v3112_v38  ;;  %3037 = vmatprep.subr.bf16.mxu1 %v3112_v38  ;;  %v3142_v61 = vld [vmem:[%s3487_s27 + $0xb4] ss:$8 sps:$4 sm:$0xff]   ;;  %v3145_v63 = vld [vmem:[%s3487_s27 + $0xb0] ss:$8 sps:$4 sm:$0xff]   ;;  %v3148_v1 = vld [vmem:[%s3487_s27 + $0xc4] ss:$8 sps:$4 sm:$0xff]  }
  0x3e   : > { %v3150_v2 = vld [vmem:[%s3487_s27 + $0x40] ss:$8 sps:$4 sm:$0xff]   ;;  %v3152_v4 = vld [vmem:[%s3487_s27 + $0x54] ss:$8 sps:$4 sm:$0xff]   ;;  %v3156_v6 = vld [vmem:[%s3487_s27 + $0x50] ss:$8 sps:$4 sm:$0xff]  }
  0x3f   : > { %v3151_v3 = vld [vmem:[%s3487_s27 + $0xc0] ss:$8 sps:$4 sm:$0xff]   ;;  %v3154_v5 = vld [vmem:[%s3487_s27 + $0xd4] ss:$8 sps:$4 sm:$0xff]   ;;  %v3157_v7 = vld [vmem:[%s3487_s27 + $0xd0] ss:$8 sps:$4 sm:$0xff]  }
  0x40   : > { %2673 = vmatpush3.bf16.msra.mxu0 %v3113_v39  ;;  %3045 = vmatpush3.bf16.msra.mxu1 %v3113_v39  ;;  %v3158_v8 = vld [vmem:[%s3487_s27 + $0x64] ss:$8 sps:$4 sm:$0xff]   ;;  %v3162_v10 = vld [vmem:[%s3487_s27 + $0x60] ss:$8 sps:$4 sm:$0xff]   ;;  %v3164_v12 = vld [vmem:[%s3487_s27 + $0x74] ss:$8 sps:$4 sm:$0xff]  }
  0x41   : > { %2674 = vmatprep.subr.bf16.mxu0 %v3114_v40  ;;  %3038 = vmatprep.subr.bf16.mxu1 %v3114_v40  ;;  %v3160_v9 = vld [vmem:[%s3487_s27 + $0xe4] ss:$8 sps:$4 sm:$0xff]   ;;  %v3163_v11 = vld [vmem:[%s3487_s27 + $0xe0] ss:$8 sps:$4 sm:$0xff]   ;;  %v3166_v13 = vld [vmem:[%s3487_s27 + $0xf4] ss:$8 sps:$4 sm:$0xff]  }
  0x42   : > { %v3168_v14 = vld [vmem:[%s3487_s27 + $0x70] ss:$8 sps:$4 sm:$0xff]  }
  0x43   : > { %v3169_v15 = vld [vmem:[%s3487_s27 + $0xf0] ss:$8 sps:$4 sm:$0xff]  }
  0x44   : > { %2675 = vmatpush3.bf16.msra.mxu0 %v3115_v41  ;;  %3046 = vmatpush3.bf16.msra.mxu1 %v3115_v41 }
  0x45   : > { %2676 = vmatprep.subr.bf16.mxu0 %v3116_v42  ;;  %3039 = vmatprep.subr.bf16.mxu1 %v3116_v42 }
  0x48   : > { %2677 = vmatpush3.bf16.msra.mxu0 %v3117_v45  ;;  %3047 = vmatpush3.bf16.msra.mxu1 %v3117_v45 }
  0x49   : > { %2678 = vmatprep.subr.bf16.mxu0 %v3118_v46  ;;  %3040 = vmatprep.subr.bf16.mxu1 %v3118_v46 }
  0x4c   : > { %2679 = vmatpush3.bf16.msra.mxu0 %v3119_v47  ;;  %3048 = vmatpush3.bf16.msra.mxu1 %v3119_v47 }
  0x4d   : > { %2680 = vmatprep.subr.bf16.mxu0 %v3120_v48  ;;  %3041 = vmatprep.subr.bf16.mxu1 %v3120_v48 }
  0x50   : > { %2681 = vmatpush3.bf16.msra.mxu0 %v3121_v49  ;;  %3049 = vmatpush3.bf16.msra.mxu1 %v3121_v49 }
  0x53   : > { %921 = vmatmul.mubr.bf16.vlgmr.msra.gmra.mxu0 %v3122_v50  ;;  %985 = vmatmul.mubr.bf16.vlgmr.msra.gmra.mxu1 %v3125_v51 }
  0x54   : > { %928 = vmatprep.mubr.bf16.mxu0 %v3128_v52  ;;  %992 = vmatprep.mubr.bf16.mxu1 %v3130_v53 }
  0x5b   : > { %929 = vmatmul.mubr.bf16.gmra.mxu0 %v3132_v54  ;;  %993 = vmatmul.mubr.bf16.gmra.mxu1 %v3133_v55 }
  0x5c   : > { %936 = vmatprep.mubr.bf16.mxu0 %v3134_v56  ;;  %1000 = vmatprep.mubr.bf16.mxu1 %v3136_v57 }
  0x63   : > { %937 = vmatmul.mubr.bf16.gmra.mxu0 %v3138_v58  ;;  %1001 = vmatmul.mubr.bf16.gmra.mxu1 %v3139_v59 }
  0x64   : > { %944 = vmatprep.mubr.bf16.mxu0 %v3140_v60  ;;  %1008 = vmatprep.mubr.bf16.mxu1 %v3142_v61 }
  0x6b   : > { %945 = vmatmul.mubr.bf16.gmra.mxu0 %v3144_v62  ;;  %1009 = vmatmul.mubr.bf16.gmra.mxu1 %v3145_v63 }
  0x6c   : > { %952 = vmatprep.mubr.bf16.mxu0 %v3146_v0  ;;  %1016 = vmatprep.mubr.bf16.mxu1 %v3148_v1 }
  0x73   : > { %953 = vmatmul.mubr.bf16.gmra.mxu0 %v3150_v2  ;;  %1017 = vmatmul.mubr.bf16.gmra.mxu1 %v3151_v3 }
  0x74   : > { %960 = vmatprep.mubr.bf16.mxu0 %v3152_v4  ;;  %1024 = vmatprep.mubr.bf16.mxu1 %v3154_v5 }
  0x7b   : > { %961 = vmatmul.mubr.bf16.gmra.mxu0 %v3156_v6  ;;  %1025 = vmatmul.mubr.bf16.gmra.mxu1 %v3157_v7 }
  0x7c   : > { %968 = vmatprep.mubr.bf16.mxu0 %v3158_v8  ;;  %1032 = vmatprep.mubr.bf16.mxu1 %v3160_v9 }
  0x83   : > { %969 = vmatmul.mubr.bf16.gmra.mxu0 %v3162_v10  ;;  %1033 = vmatmul.mubr.bf16.gmra.mxu1 %v3163_v11 }
  0x84   : > { %976 = vmatprep.mubr.bf16.mxu0 %v3164_v12  ;;  %1040 = vmatprep.mubr.bf16.mxu1 %v3166_v13 }
  0x8b   : > { %977 = vmatmul.mubr.bf16.gmra.mxu0 %v3168_v14  ;;  %1041 = vmatmul.mubr.bf16.gmra.mxu1 %v3169_v15 }
 0x113   : > { %v2682_v16 = vpop.f32.mrf.mxu0  ;;  %v2730_v17 = vpop.f32.mrf.mxu1 }
 0x115   : > { %v2683_v18 = vpop.f32.mrf.mxu0  ;;  %v2731_v19 = vpop.f32.mrf.mxu1 }
 0x116   : > { %v3527_v20 = vadd.f32 %v2683_v18, %v2682_v16  ;;  %v3529_v21 = vadd.f32 %v2731_v19, %v2730_v17 }
 0x117   : > { %v2685_v22 = vpop.f32.mrf.mxu0  ;;  %v2733_v23 = vpop.f32.mrf.mxu1 }
 0x119   : > { %v2686_v24 = vpop.f32.mrf.mxu0  ;;  %v2734_v25 = vpop.f32.mrf.mxu1 }
 0x11a   : > { %v3531_v26 = vadd.f32 %v2686_v24, %v2685_v22  ;;  %v3533_v27 = vadd.f32 %v2734_v25, %v2733_v23 }
 0x11b   : > { %v2688_v28 = vpop.f32.mrf.mxu0  ;;  %v2736_v29 = vpop.f32.mrf.mxu1 }
 0x11d   : > { %v2689_v30 = vpop.f32.mrf.mxu0  ;;  %v2737_v31 = vpop.f32.mrf.mxu1 }
 0x11e   : > { %v3535_v32 = vadd.f32 %v2689_v30, %v2688_v28  ;;  %v3537_v33 = vadd.f32 %v2737_v31, %v2736_v29 }
 0x11f   : > { %v2691_v34 = vpop.f32.mrf.mxu0  ;;  %v2739_v35 = vpop.f32.mrf.mxu1 }
 0x121   : > { %v2692_v36 = vpop.f32.mrf.mxu0  ;;  %v2740_v37 = vpop.f32.mrf.mxu1 }
 0x122   : > { %v3539_v38 = vadd.f32 %v2692_v36, %v2691_v34  ;;  %v3541_v39 = vadd.f32 %v2740_v37, %v2739_v35 }
 0x123   : > { %v2694_v40 = vpop.f32.mrf.mxu0  ;;  %v2742_v41 = vpop.f32.mrf.mxu1 }
 0x125   : > { %v2695_v42 = vpop.f32.mrf.mxu0  ;;  %v2743_v43 = vpop.f32.mrf.mxu1 }
 0x126   : > { %v3543_v44 = vadd.f32 %v2695_v42, %v2694_v40  ;;  %v3545_v45 = vadd.f32 %v2743_v43, %v2742_v41 }
 0x127   : > { %v2697_v46 = vpop.f32.mrf.mxu0  ;;  %v2745_v47 = vpop.f32.mrf.mxu1 }
 0x129   : > { %v2698_v48 = vpop.f32.mrf.mxu0  ;;  %v2746_v49 = vpop.f32.mrf.mxu1 }
 0x12a   : > { %v3547_v50 = vadd.f32 %v2698_v48, %v2697_v46  ;;  %v3549_v51 = vadd.f32 %v2746_v49, %v2745_v47 }
 0x12b   : > { %v2700_v52 = vpop.f32.mrf.mxu0  ;;  %v2748_v53 = vpop.f32.mrf.mxu1 }
 0x12d   : > { %v2701_v54 = vpop.f32.mrf.mxu0  ;;  %v2749_v55 = vpop.f32.mrf.mxu1 }
 0x12e   : > { %v3551_v56 = vadd.f32 %v2701_v54, %v2700_v52  ;;  %v3553_v57 = vadd.f32 %v2749_v55, %v2748_v53 }
 0x12f   : > { %v2703_v58 = vpop.f32.mrf.mxu0  ;;  %v2751_v59 = vpop.f32.mrf.mxu1 }
 0x131   : > { %v2704_v60 = vpop.f32.mrf.mxu0  ;;  %v2752_v61 = vpop.f32.mrf.mxu1 }
 0x132   : > { %v3555_v62 = vadd.f32 %v2704_v60, %v2703_v58  ;;  %v3557_v63 = vadd.f32 %v2752_v61, %v2751_v59 }
 0x133   : > { %v2706_v0 = vpop.f32.mrf.mxu0  ;;  %v2754_v1 = vpop.f32.mrf.mxu1 }
 0x135   : > { %v2707_v2 = vpop.f32.mrf.mxu0  ;;  %v2755_v3 = vpop.f32.mrf.mxu1 }
 0x136   : > { %v3559_v4 = vadd.f32 %v2707_v2, %v2706_v0  ;;  %v3561_v5 = vadd.f32 %v2755_v3, %v2754_v1 }
 0x137   : > { %v2709_v6 = vpop.f32.mrf.mxu0  ;;  %v2757_v7 = vpop.f32.mrf.mxu1 }
 0x139   : > { %v2710_v8 = vpop.f32.mrf.mxu0  ;;  %v2758_v9 = vpop.f32.mrf.mxu1 }
 0x13a   : > { %v3563_v10 = vadd.f32 %v2710_v8, %v2709_v6  ;;  %v3565_v11 = vadd.f32 %v2758_v9, %v2757_v7 }
 0x13b   : > { %v2712_v12 = vpop.f32.mrf.mxu0  ;;  %v2760_v13 = vpop.f32.mrf.mxu1 }
 0x13d   : > { %v2713_v14 = vpop.f32.mrf.mxu0  ;;  %v2761_v15 = vpop.f32.mrf.mxu1 }
 0x13e   : > { %v3567_v16 = vadd.f32 %v2713_v14, %v2712_v12  ;;  %v3569_v17 = vadd.f32 %v2761_v15, %v2760_v13 }
 0x13f   : > { %v2715_v18 = vpop.f32.mrf.mxu0  ;;  %v2763_v19 = vpop.f32.mrf.mxu1 }
 0x141   : > { %v2716_v22 = vpop.f32.mrf.mxu0  ;;  %v2764_v23 = vpop.f32.mrf.mxu1 }
 0x142   : > { %v3571_v24 = vadd.f32 %v2716_v22, %v2715_v18  ;;  %v3573_v25 = vadd.f32 %v2764_v23, %v2763_v19 }
 0x143   : > { %v2718_v28 = vpop.f32.mrf.mxu0  ;;  %v2766_v29 = vpop.f32.mrf.mxu1 }
 0x145   : > { %v2719_v30 = vpop.f32.mrf.mxu0  ;;  %v2767_v31 = vpop.f32.mrf.mxu1 }
 0x146   : > { %v3575_v34 = vadd.f32 %v2719_v30, %v2718_v28  ;;  %v3577_v35 = vadd.f32 %v2767_v31, %v2766_v29 }
 0x147   : > { %v2721_v36 = vpop.f32.mrf.mxu0  ;;  %v2769_v37 = vpop.f32.mrf.mxu1 }
 0x149   : > { %v2722_v40 = vpop.f32.mrf.mxu0  ;;  %v2770_v41 = vpop.f32.mrf.mxu1 }
 0x14a   : > { %v3579_v42 = vadd.f32 %v2722_v40, %v2721_v36  ;;  %v3581_v43 = vadd.f32 %v2770_v41, %v2769_v37 }
 0x14b   : > { %v2724_v46 = vpop.f32.mrf.mxu0  ;;  %v2772_v47 = vpop.f32.mrf.mxu1 }
 0x14d   : > { %v2725_v48 = vpop.f32.mrf.mxu0  ;;  %v2773_v49 = vpop.f32.mrf.mxu1 }
 0x14e   : > { %v3583_v52 = vadd.f32 %v2725_v48, %v2724_v46  ;;  %v3585_v53 = vadd.f32 %v2773_v49, %v2772_v47  ;;  %1052 = sbr.rel (%p2608_p11) target bundleno = 355 (0x163), region = 102 }
 0x14f   : > { %v2727_v54 = vpop.f32.mrf.mxu0  ;;  %v2775_v55 = vpop.f32.mrf.mxu1 }
 0x151   : > { %v2728_v58 = vpop.f32.mrf.mxu0  ;;  %v2776_v59 = vpop.f32.mrf.mxu1 }
 0x152   : > { %v3587_v60 = vadd.f32 %v2728_v58, %v2727_v54  ;;  %v3589_v61 = vadd.f32 %v2776_v59, %v2775_v55 }
 0x153   : > { %1053 = vst [vmem:[#allocation2 + $0x160] sm:$0xff] %v3527_v20  ;;  %1054 = vst [vmem:[#allocation2 + $0x168] sm:$0xff] %v3531_v26 }
 0x154   : > { %1055 = vst [vmem:[#allocation2 + $0x1b0] sm:$0xff] %v3535_v32  ;;  %1056 = vst [vmem:[#allocation2 + $0x30] sm:$0xff] %v3539_v38 }
 0x155   : > { %1057 = vst [vmem:[#allocation2 + $0xa0] sm:$0xff] %v3543_v44  ;;  %1058 = vst [vmem:[#allocation2 + $0xd8] sm:$0xff] %v3547_v50 }
 0x156   : > { %1059 = vst [vmem:[#allocation2 + $0x68] sm:$0xff] %v3551_v56  ;;  %1060 = vst [vmem:[#allocation2 + $0x90] sm:$0xff] %v3555_v62 }
 0x157   : > { %1061 = vst [vmem:[#allocation2 + $0x108] sm:$0xff] %v3559_v4  ;;  %1062 = vst [vmem:[#allocation2 + $0x28] sm:$0xff] %v3563_v10 }
 0x158   : > { %1063 = vst [vmem:[#allocation2 + $0x38] sm:$0xff] %v3567_v16  ;;  %1064 = vst [vmem:[#allocation2 + $0x130] sm:$0xff] %v3571_v24 }
 0x159   : > { %1065 = vst [vmem:[#allocation2 + $0x48] sm:$0xff] %v3575_v34  ;;  %1066 = vst [vmem:[#allocation2 + $0xa8] sm:$0xff] %v3579_v42 }
 0x15a   : > { %1067 = vst [vmem:[#allocation2 + $0x18] sm:$0xff] %v3583_v52  ;;  %1068 = vst [vmem:[#allocation2 + $0xc0] sm:$0xff] %v3587_v60 }
 0x15b   : > { %1069 = vst [vmem:[#allocation2 + $0x1c0] sm:$0xff] %v3529_v21  ;;  %1070 = vst [vmem:[#allocation2 + $0x118] sm:$0xff] %v3533_v27 }
 0x15c   : > { %1071 = vst [vmem:[#allocation2 + $0x78] sm:$0xff] %v3537_v33  ;;  %1072 = vst [vmem:[#allocation2 + $0x88] sm:$0xff] %v3541_v39 }
 0x15d   : > { %1073 = vst [vmem:[#allocation2 + $0x100] sm:$0xff] %v3545_v45  ;;  %1074 = vst [vmem:[#allocation2 + $0x158] sm:$0xff] %v3549_v51 }
 0x15e   : > { %1075 = vst [vmem:[#allocation2 + $0x178] sm:$0xff] %v3553_v57  ;;  %1076 = vst [vmem:[#allocation2 + $0x50] sm:$0xff] %v3557_v63 }
 0x15f   : > { %1077 = vst [vmem:[#allocation2 + $0x1d8] sm:$0xff] %v3561_v5  ;;  %1078 = vst [vmem:[#allocation2 + $0x1f0] sm:$0xff] %v3565_v11 }
 0x160   : > { %1079 = vst [vmem:[#allocation2 + $0xc8] sm:$0xff] %v3569_v17  ;;  %1080 = vst [vmem:[#allocation2 + $0x60] sm:$0xff] %v3573_v25 }
 0x161   : > { %1081 = vst [vmem:[#allocation2 + $0x1c8] sm:$0xff] %v3577_v35  ;;  %1082 = vst [vmem:[#allocation2] sm:$0xff] %v3581_v43 }
 0x162   : > { %1083 = vst [vmem:[#allocation2 + $0x1e0] sm:$0xff] %v3585_v53  ;;  %1084 = vst [vmem:[#allocation2 + $0x10] sm:$0xff] %v3589_v61 }
 0x163 PF: > { %p2609_p12 = scmp.le.s32.totalorder %s3256_s15, 0 }
 0x165   : > { %1088 = sbr.rel (%p2609_p12) target bundleno = 381 (0x17d), region = 106 }
 0x16a   : > { %v1089_v0 = vld [vmem:[#allocation2 + $0x160] sm:$0xff]  ;;  %v1090_v1 = vld [vmem:[#allocation2 + $0x168] sm:$0xff]  ;;  %v1091_v2 = vld [vmem:[#allocation2 + $0x1b0] sm:$0xff] }
 0x16b   : > { %v1121_v3 = vadd.f32 %v3527_v20, %v1089_v0  ;;  %v1122_v6 = vadd.f32 %v3531_v26, %v1090_v1  ;;  %v1123_v7 = vadd.f32 %v3535_v32, %v1091_v2  ;;  %v1092_v8 = vld [vmem:[#allocation2 + $0x30] sm:$0xff]  ;;  %v1093_v9 = vld [vmem:[#allocation2 + $0xa0] sm:$0xff]  ;;  %v1094_v12 = vld [vmem:[#allocation2 + $0xd8] sm:$0xff] }
 0x16c   : > { %v1124_v13 = vadd.f32 %v3539_v38, %v1092_v8  ;;  %v1125_v14 = vadd.f32 %v3543_v44, %v1093_v9  ;;  %v1126_v15 = vadd.f32 %v3547_v50, %v1094_v12  ;;  %v1095_v18 = vld [vmem:[#allocation2 + $0x68] sm:$0xff]  ;;  %v1096_v19 = vld [vmem:[#allocation2 + $0x90] sm:$0xff]  ;;  %v1099_v28 = vld [vmem:[#allocation2 + $0x38] sm:$0xff] }
 0x16d   : > { %v1097_v22 = vld [vmem:[#allocation2 + $0x108] sm:$0xff]  ;;  %1153 = vst [vmem:[#allocation2 + $0x160] sm:$0xff] %v1121_v3  ;;  %1154 = vst [vmem:[#allocation2 + $0x168] sm:$0xff] %v1122_v6  ;;  %v1127_v20 = vadd.f32 %v3551_v56, %v1095_v18  ;;  %v1128_v26 = vadd.f32 %v3555_v62, %v1096_v19  ;;  %v1100_v29 = vld [vmem:[#allocation2 + $0x130] sm:$0xff]  ;;  %v1131_v44 = vadd.f32 %v3567_v16, %v1099_v28 }
 0x16e   : > { %1155 = vst [vmem:[#allocation2 + $0x1b0] sm:$0xff] %v1123_v7  ;;  %v1129_v32 = vadd.f32 %v3559_v4, %v1097_v22  ;;  %v1098_v23 = vld [vmem:[#allocation2 + $0x28] sm:$0xff]  ;;  %1156 = vst [vmem:[#allocation2 + $0x30] sm:$0xff] %v1124_v13  ;;  %v1132_v50 = vadd.f32 %v3571_v24, %v1100_v29  ;;  %v1103_v36 = vld [vmem:[#allocation2 + $0x18] sm:$0xff] }
 0x16f   : > { %1157 = vst [vmem:[#allocation2 + $0xa0] sm:$0xff] %v1125_v14  ;;  %1158 = vst [vmem:[#allocation2 + $0xd8] sm:$0xff] %v1126_v15  ;;  %v1130_v38 = vadd.f32 %v3563_v10, %v1098_v23  ;;  %v1101_v30 = vld [vmem:[#allocation2 + $0x48] sm:$0xff]  ;;  %v1135_v4 = vadd.f32 %v3583_v52, %v1103_v36  ;;  %v1104_v37 = vld [vmem:[#allocation2 + $0xc0] sm:$0xff] }
 0x170   : > { %v1102_v31 = vld [vmem:[#allocation2 + $0xa8] sm:$0xff]  ;;  %1159 = vst [vmem:[#allocation2 + $0x68] sm:$0xff] %v1127_v20  ;;  %1160 = vst [vmem:[#allocation2 + $0x90] sm:$0xff] %v1128_v26  ;;  %v1133_v56 = vadd.f32 %v3575_v34, %v1101_v30  ;;  %v1105_v40 = vld [vmem:[#allocation2 + $0x1c0] sm:$0xff]  ;;  %v1136_v10 = vadd.f32 %v3587_v60, %v1104_v37 }
 0x171   : > { %1161 = vst [vmem:[#allocation2 + $0x108] sm:$0xff] %v1129_v32  ;;  %v1134_v62 = vadd.f32 %v3579_v42, %v1102_v31  ;;  %v1106_v41 = vld [vmem:[#allocation2 + $0x118] sm:$0xff]  ;;  %1162 = vst [vmem:[#allocation2 + $0x28] sm:$0xff] %v1130_v38  ;;  %v1137_v16 = vadd.f32 %v3529_v21, %v1105_v40  ;;  %v1108_v47 = vld [vmem:[#allocation2 + $0x88] sm:$0xff] }
 0x172   : > { %1163 = vst [vmem:[#allocation2 + $0x38] sm:$0xff] %v1131_v44  ;;  %1164 = vst [vmem:[#allocation2 + $0x130] sm:$0xff] %v1132_v50  ;;  %v1138_v24 = vadd.f32 %v3533_v27, %v1106_v41  ;;  %v1107_v46 = vld [vmem:[#allocation2 + $0x78] sm:$0xff]  ;;  %v1109_v48 = vld [vmem:[#allocation2 + $0x100] sm:$0xff]  ;;  %v1140_v42 = vadd.f32 %v3541_v39, %v1108_v47 }
 0x173   : > { %1165 = vst [vmem:[#allocation2 + $0x48] sm:$0xff] %v1133_v56  ;;  %1166 = vst [vmem:[#allocation2 + $0xa8] sm:$0xff] %v1134_v62  ;;  %v1139_v34 = vadd.f32 %v3537_v33, %v1107_v46  ;;  %v1141_v49 = vadd.f32 %v3545_v45, %v1109_v48  ;;  %v1110_v52 = vld [vmem:[#allocation2 + $0x158] sm:$0xff]  ;;  %v1112_v55 = vld [vmem:[#allocation2 + $0x50] sm:$0xff] }
 0x174   : > { %1167 = vst [vmem:[#allocation2 + $0x18] sm:$0xff] %v1135_v4  ;;  %v1111_v54 = vld [vmem:[#allocation2 + $0x178] sm:$0xff]  ;;  %1168 = vst [vmem:[#allocation2 + $0xc0] sm:$0xff] %v1136_v10  ;;  %v1142_v21 = vadd.f32 %v3549_v51, %v1110_v52  ;;  %v1144_v58 = vadd.f32 %v3557_v63, %v1112_v55  ;;  %v1114_v60 = vld [vmem:[#allocation2 + $0x1f0] sm:$0xff] }
 0x175   : > { %1169 = vst [vmem:[#allocation2 + $0x1c0] sm:$0xff] %v1137_v16  ;;  %1170 = vst [vmem:[#allocation2 + $0x118] sm:$0xff] %v1138_v24  ;;  %v1143_v27 = vadd.f32 %v3553_v57, %v1111_v54  ;;  %v1113_v59 = vld [vmem:[#allocation2 + $0x1d8] sm:$0xff]  ;;  %v1115_v0 = vld [vmem:[#allocation2 + $0xc8] sm:$0xff]  ;;  %v1146_v39 = vadd.f32 %v3565_v11, %v1114_v60 }
 0x176   : > { %1171 = vst [vmem:[#allocation2 + $0x78] sm:$0xff] %v1139_v34  ;;  %1172 = vst [vmem:[#allocation2 + $0x88] sm:$0xff] %v1140_v42  ;;  %v1145_v33 = vadd.f32 %v3561_v5, %v1113_v59  ;;  %v1147_v45 = vadd.f32 %v3569_v17, %v1115_v0  ;;  %v1116_v1 = vld [vmem:[#allocation2 + $0x60] sm:$0xff]  ;;  %v1117_v2 = vld [vmem:[#allocation2 + $0x1c8] sm:$0xff] }
 0x177   : > { %1173 = vst [vmem:[#allocation2 + $0x100] sm:$0xff] %v1141_v49  ;;  %v1118_v3 = vld [vmem:[#allocation2] sm:$0xff]  ;;  %1174 = vst [vmem:[#allocation2 + $0x158] sm:$0xff] %v1142_v21  ;;  %v1148_v51 = vadd.f32 %v3573_v25, %v1116_v1  ;;  %v1149_v57 = vadd.f32 %v3577_v35, %v1117_v2  ;;  %v1120_v7 = vld [vmem:[#allocation2 + $0x10] sm:$0xff] }
 0x178   : > { %1175 = vst [vmem:[#allocation2 + $0x178] sm:$0xff] %v1143_v27  ;;  %1176 = vst [vmem:[#allocation2 + $0x50] sm:$0xff] %v1144_v58  ;;  %v1150_v63 = vadd.f32 %v3581_v43, %v1118_v3  ;;  %v1119_v6 = vld [vmem:[#allocation2 + $0x1e0] sm:$0xff]  ;;  %v1152_v11 = vadd.f32 %v3589_v61, %v1120_v7 }
 0x179   : > { %1177 = vst [vmem:[#allocation2 + $0x1d8] sm:$0xff] %v1145_v33  ;;  %1178 = vst [vmem:[#allocation2 + $0x1f0] sm:$0xff] %v1146_v39  ;;  %v1151_v5 = vadd.f32 %v3585_v53, %v1119_v6 }
 0x17a   : > { %1179 = vst [vmem:[#allocation2 + $0xc8] sm:$0xff] %v1147_v45  ;;  %1180 = vst [vmem:[#allocation2 + $0x60] sm:$0xff] %v1148_v51 }
 0x17b   : > { %1181 = vst [vmem:[#allocation2 + $0x1c8] sm:$0xff] %v1149_v57  ;;  %1182 = vst [vmem:[#allocation2] sm:$0xff] %v1150_v63 }
 0x17c   : > { %1183 = vst [vmem:[#allocation2 + $0x1e0] sm:$0xff] %v1151_v5  ;;  %1184 = vst [vmem:[#allocation2 + $0x10] sm:$0xff] %v1152_v11 }
 0x17d PF: > { %p2610_p13 = scmp.ne.s32.totalorder %s3256_s15, 1 }
 0x17f   : > { %1188 = sbr.rel (%p2610_p13) target bundleno = 1156 (0x484), region = 110 }
 0x184   : > { %v3170_v17 = vld [vmem:[%s4034_s4 + $0x38] sm:$0xff]   ;;  %v3171_v25 = vld [vmem:[%s4034_s4 + $0x30] sm:$0xff]   ;;  %v3172_v35 = vld [vmem:[%s4034_s4 + $0x28] sm:$0xff]  }
 0x185   : > { %2938 = vmatprep.subr.bf16.mxu0 %v3170_v17  ;;  %v3173_v43 = vld [vmem:[%s4034_s4 + $0x20] sm:$0xff]   ;;  %v3174_v61 = vld [vmem:[%s4034_s4 + $0x18] sm:$0xff]   ;;  %v3175_v8 = vld [vmem:[%s4034_s4 + $0x10] sm:$0xff]  }
 0x186   : > { %2939 = vmatpush3.bf16.msra.mxu0 %v3170_v17  ;;  %v3178_v53 = vld [vmem:[%s3469_s16] sm:$0xff]   ;;  %v3176_v9 = vld [vmem:[%s4034_s4 + $0x8] sm:$0xff]   ;;  %v3194_v13 = vld [vmem:[%s4036_s6 + $0x78] sm:$0xff]  }
 0x187   : > { %2940 = vmatprep.subr.bf16.mxu0 %v3171_v25  ;;  %2954 = vmatprep.mubr.bf16.mxu0 %v3178_v53  ;;  %v3177_v12 = vld [vmem:[%s4034_s4] sm:$0xff]   ;;  %v3195_v14 = vld [vmem:[%s4036_s6 + $0x38] sm:$0xff]   ;;  %v3196_v15 = vld [vmem:[%s4036_s6 + $0x70] sm:$0xff]  }
 0x188   : > { %2802 = vmatprep.subr.bf16.mxu1 %v3194_v13  ;;  %v3197_v18 = vld [vmem:[%s4036_s6 + $0x30] sm:$0xff]   ;;  %v3179_v19 = vld [vmem:[%s3469_s16 + $0x8] sm:$0xff]   ;;  %v3181_v32 = vld [vmem:[%s3469_s16 + $0x18] sm:$0xff]  }
 0x189   : > { %2803 = vmatpush3.bf16.msra.mxu1 %v3195_v14  ;;  %v3198_v22 = vld [vmem:[%s4036_s6 + $0x68] sm:$0xff]   ;;  %v3180_v20 = vld [vmem:[%s3469_s16 + $0x10] sm:$0xff]   ;;  %v3182_v23 = vld [vmem:[%s3469_s16 + $0x20] sm:$0xff]  }
 0x18a   : > { %2941 = vmatpush3.bf16.msra.mxu0 %v3171_v25  ;;  %2804 = vmatprep.subr.bf16.mxu1 %v3196_v15  ;;  %v3199_v26 = vld [vmem:[%s4036_s6 + $0x28] sm:$0xff]   ;;  %v3184_v29 = vld [vmem:[%s3469_s16 + $0x30] sm:$0xff]   ;;  %v3185_v38 = vld [vmem:[%s3469_s16 + $0x38] sm:$0xff]  }
 0x18b   : > { %2942 = vmatprep.subr.bf16.mxu0 %v3172_v35  ;;  %v3183_v28 = vld [vmem:[%s3469_s16 + $0x28] sm:$0xff]   ;;  %v3186_v44 = vld [vmem:[%s3469_s16 + $0x40] sm:$0xff]   ;;  %v3188_v30 = vld [vmem:[%s3469_s16 + $0x50] sm:$0xff]  }
 0x18c   : > { %v3187_v50 = vld [vmem:[%s3469_s16 + $0x48] sm:$0xff]   ;;  %v3189_v31 = vld [vmem:[%s3469_s16 + $0x58] sm:$0xff]   ;;  %v3190_v36 = vld [vmem:[%s3469_s16 + $0x60] sm:$0xff]  }
 0x18d   : > { %2805 = vmatpush3.bf16.msra.mxu1 %v3197_v18  ;;  %v3191_v56 = vld [vmem:[%s3469_s16 + $0x68] sm:$0xff]   ;;  %v3192_v62 = vld [vmem:[%s3469_s16 + $0x70] sm:$0xff]   ;;  %v3193_v4 = vld [vmem:[%s3469_s16 + $0x78] sm:$0xff]  }
 0x18e   : > { %2943 = vmatpush3.bf16.msra.mxu0 %v3172_v35  ;;  %2806 = vmatprep.subr.bf16.mxu1 %v3198_v22  ;;  %v3200_v37 = vld [vmem:[%s4036_s6 + $0x60] sm:$0xff]   ;;  %v3202_v41 = vld [vmem:[%s4036_s6 + $0x58] sm:$0xff]   ;;  %v3204_v16 = vld [vmem:[%s4036_s6 + $0x50] sm:$0xff]  }
 0x18f   : > { %2944 = vmatprep.subr.bf16.mxu0 %v3173_v43  ;;  %v3201_v40 = vld [vmem:[%s4036_s6 + $0x20] sm:$0xff]   ;;  %v3203_v10 = vld [vmem:[%s4036_s6 + $0x18] sm:$0xff]   ;;  %v3205_v24 = vld [vmem:[%s4036_s6 + $0x10] sm:$0xff]  }
 0x190   : > { %v3206_v46 = vld [vmem:[%s4036_s6 + $0x48] sm:$0xff]   ;;  %v1189_v48 = vld [vmem:[#allocation2 + $0x160] sm:$0xff]  ;;  %v1191_v59 = vld [vmem:[#allocation2 + $0x1b0] sm:$0xff] }
 0x191   : > { %2807 = vmatpush3.bf16.msra.mxu1 %v3199_v26  ;;  %v3207_v47 = vld [vmem:[%s4036_s6 + $0x8] sm:$0xff]   ;;  %v3743_v42 = vld [vmem:[%s4033_s3] ss:$0 sm:$0xff]  ;;  %v1192_v60 = vld [vmem:[#allocation2 + $0x30] sm:$0xff] }
 0x192   : > { %2945 = vmatpush3.bf16.msra.mxu0 %v3173_v43  ;;  %2808 = vmatprep.subr.bf16.mxu1 %v3200_v37  ;;  %v1190_v34 = vld [vmem:[#allocation2 + $0x168] sm:$0xff]  ;;  %v3208_v49 = vld [vmem:[%s4036_s6 + $0x40] sm:$0xff]   ;;  %v1228_v52 = vadd.f32 %v3743_v42, %v1189_v48  ;;  %v1230_v0 = vadd.f32 %v3743_v42, %v1191_v59  ;;  %v1231_v33 = vadd.f32 %v3743_v42, %v1192_v60  ;;  %v1194_v3 = vld [vmem:[#allocation2 + $0xd8] sm:$0xff] }
 0x193   : > { %2946 = vmatprep.subr.bf16.mxu0 %v3174_v61  ;;  %v1229_v54 = vadd.f32 %v3743_v42, %v1190_v34  ;;  %v3209_v55 = vld [vmem:[%s4036_s6] sm:$0xff]   ;;  %v1233_v57 = vadd.f32 %v3743_v42, %v1194_v3  ;;  %v1195_v5 = vld [vmem:[#allocation2 + $0x68] sm:$0xff]  ;;  %v1196_v11 = vld [vmem:[#allocation2 + $0x90] sm:$0xff] }
 0x194   : > { %v1260_v21 = vmax.f32 %v1228_v52, 0.0  ;;  %v1262_v39 = vmax.f32 %v1230_v0, 0.0  ;;  %v1263_v45 = vmax.f32 %v1231_v33, 0.0  ;;  %v1193_v2 = vld [vmem:[#allocation2 + $0xa0] sm:$0xff]  ;;  %v1234_v17 = vadd.f32 %v3743_v42, %v1195_v5  ;;  %v1199_v18 = vld [vmem:[#allocation2 + $0x38] sm:$0xff]  ;;  %v1208_v52 = vld [vmem:[#allocation2 + $0x88] sm:$0xff] }
 0x195   : > { %2809 = vmatpush3.bf16.msra.mxu1 %v3201_v40  ;;  %v1261_v27 = vmax.f32 %v1229_v54, 0.0  ;;  %v1232_v51 = vadd.f32 %v3743_v42, %v1193_v2  ;;  %v1265_v6 = vmax.f32 %v1233_v57, 0.0  ;;  %v1235_v25 = vadd.f32 %v3743_v42, %v1196_v11  ;;  %v1209_v60 = vld [vmem:[#allocation2 + $0x100] sm:$0xff]  ;;  %v1210_v0 = vld [vmem:[#allocation2 + $0x158] sm:$0xff]  ;;  %v1212_v57 = vld [vmem:[#allocation2 + $0x50] sm:$0xff] }
 0x196   : > { %2947 = vmatpush3.bf16.msra.mxu0 %v3174_v61  ;;  %2810 = vmatprep.subr.bf16.mxu1 %v3202_v41  ;;  %1292 = vst [vmem:[#allocation2 + $0x160] sm:$0xff] %v1260_v21  ;;  %1294 = vst [vmem:[#allocation2 + $0x1b0] sm:$0xff] %v1262_v39  ;;  %v3757_v1 = vpack.c.bf16 %v1263_v45, %v1262_v39  ;;  %v1266_v35 = vmax.f32 %v1234_v17, 0.0  ;;  %v1197_v61 = vld [vmem:[#allocation2 + $0x108] sm:$0xff]  ;;  %v1238_v22 = vadd.f32 %v3743_v42, %v1199_v18 }
 0x197   : > { %2948 = vmatprep.subr.bf16.mxu0 %v3175_v8  ;;  %1293 = vst [vmem:[#allocation2 + $0x168] sm:$0xff] %v1261_v27  ;;  %v3753_v58 = vpack.c.bf16 %v1261_v27, %v1260_v21  ;;  %1295 = vst [vmem:[#allocation2 + $0x30] sm:$0xff] %v1263_v45  ;;  %v1264_v63 = vmax.f32 %v1232_v51, 0.0  ;;  %v1267_v43 = vmax.f32 %v1235_v25, 0.0  ;;  %v1248_v33 = vadd.f32 %v3743_v42, %v1209_v60  ;;  %v1211_v51 = vld [vmem:[#allocation2 + $0x178] sm:$0xff] }
 0x198   : > { %1297 = vst [vmem:[#allocation2 + $0xd8] sm:$0xff] %v1265_v6  ;;  %1298 = vst [vmem:[#allocation2 + $0x68] sm:$0xff] %v1266_v35  ;;  %v1270_v26 = vmax.f32 %v1238_v22, 0.0  ;;  %v1249_v39 = vadd.f32 %v3743_v42, %v1210_v0  ;;  %v1213_v25 = vld [vmem:[#allocation2 + $0x1d8] sm:$0xff] }
 0x199   : > { %2811 = vmatpush3.bf16.msra.mxu1 %v3203_v10  ;;  %1296 = vst [vmem:[#allocation2 + $0xa0] sm:$0xff] %v1264_v63  ;;  %v3761_v7 = vpack.c.bf16 %v1265_v6, %v1264_v63  ;;  %1299 = vst [vmem:[#allocation2 + $0x90] sm:$0xff] %v1267_v43  ;;  %v3765_v53 = vpack.c.bf16 %v1267_v43, %v1266_v35  ;;  %v1205_v10 = vld [vmem:[#allocation2 + $0x1c0] sm:$0xff]  ;;  %v1280_v45 = vmax.f32 %v1248_v33, 0.0  ;;  %v1214_v35 = vld [vmem:[#allocation2 + $0x1f0] sm:$0xff] }
 0x19a   : > { %2949 = vmatpush3.bf16.msra.mxu0 %v3175_v8  ;;  %2812 = vmatprep.subr.bf16.mxu1 %v3204_v16  ;;  %v1198_v8 = vld [vmem:[#allocation2 + $0x28] sm:$0xff]  ;;  %1302 = vst [vmem:[#allocation2 + $0x38] sm:$0xff] %v1270_v26  ;;  %v1206_v16 = vld [vmem:[#allocation2 + $0x118] sm:$0xff]  ;;  %v1281_v2 = vmax.f32 %v1249_v39, 0.0  ;;  %v1250_v63 = vadd.f32 %v3743_v42, %v1211_v51  ;;  %v1251_v6 = vadd.f32 %v3743_v42, %v1212_v57 }
 0x19b   : > { %2950 = vmatprep.subr.bf16.mxu0 %v3176_v9  ;;  %1312 = vst [vmem:[#allocation2 + $0x100] sm:$0xff] %v1280_v45  ;;  %v1252_v43 = vadd.f32 %v3743_v42, %v1213_v25  ;;  %v3212_v51 = vld [vmem:[%s4038_s8 + $0x28] sm:$0xff]  }
 0x19c   : > { %1313 = vst [vmem:[#allocation2 + $0x158] sm:$0xff] %v1281_v2  ;;  %v3793_v3 = vpack.c.bf16 %v1281_v2, %v1280_v45  ;;  %v1282_v5 = vmax.f32 %v1250_v63, 0.0  ;;  %v1283_v11 = vmax.f32 %v1251_v6, 0.0 }
 0x19d   : > { %2813 = vmatpush3.bf16.msra.mxu1 %v3205_v24  ;;  %v1244_v24 = vadd.f32 %v3743_v42, %v1205_v10 }
 0x19e   : > { %2951 = vmatpush3.bf16.msra.mxu0 %v3176_v9  ;;  %2814 = vmatprep.subr.bf16.mxu1 %v3206_v46  ;;  %v1236_v9 = vadd.f32 %v3743_v42, %v1197_v61  ;;  %v1245_v46 = vadd.f32 %v3743_v42, %v1206_v16  ;;  %1314 = vst [vmem:[#allocation2 + $0x178] sm:$0xff] %v1282_v5  ;;  %1315 = vst [vmem:[#allocation2 + $0x50] sm:$0xff] %v1283_v11 }
 0x19f   : > { %2952 = vmatprep.subr.bf16.mxu0 %v3177_v12  ;;  %v3797_v17 = vpack.c.bf16 %v1283_v11, %v1282_v5  ;;  %v1253_v61 = vadd.f32 %v3743_v42, %v1214_v35 }
 0x1a0   : > { %v1268_v13 = vmax.f32 %v1236_v9, 0.0  ;;  %v1277_v48 = vmax.f32 %v1245_v46, 0.0 }
 0x1a1   : > { %2815 = vmatpush3.bf16.msra.mxu1 %v3207_v47  ;;  %v1276_v47 = vmax.f32 %v1244_v24, 0.0  ;;  %v1285_v9 = vmax.f32 %v1253_v61, 0.0 }
 0x1a2   : > { %2953 = vmatpush3.bf16.msra.mxu0 %v3177_v12  ;;  %2816 = vmatprep.subr.bf16.mxu1 %v3208_v49  ;;  %v1237_v12 = vadd.f32 %v3743_v42, %v1198_v8  ;;  %1300 = vst [vmem:[#allocation2 + $0x108] sm:$0xff] %v1268_v13  ;;  %1309 = vst [vmem:[#allocation2 + $0x118] sm:$0xff] %v1277_v48  ;;  %v1207_v49 = vld [vmem:[#allocation2 + $0x78] sm:$0xff]  ;;  %v1284_v8 = vmax.f32 %v1252_v43, 0.0 }
 0x1a3   : > { %1308 = vst [vmem:[#allocation2 + $0x1c0] sm:$0xff] %v1276_v47  ;;  %v3785_v34 = vpack.c.bf16 %v1277_v48, %v1276_v47  ;;  %v1246_v54 = vadd.f32 %v3743_v42, %v1207_v49  ;;  %1317 = vst [vmem:[#allocation2 + $0x1f0] sm:$0xff] %v1285_v9 }
 0x1a4   : > { %v1269_v14 = vmax.f32 %v1237_v12, 0.0  ;;  %1316 = vst [vmem:[#allocation2 + $0x1d8] sm:$0xff] %v1284_v8  ;;  %v3801_v12 = vpack.c.bf16 %v1285_v9, %v1284_v8 }
 0x1a5   : > { %2955 = vmatmul.mubr.bf16.vlgmr.msra.gmra.mxu0 %v3179_v19  ;;  %2817 = vmatpush3.bf16.msra.mxu1 %v3209_v55  ;;  %v1200_v19 = vld [vmem:[#allocation2 + $0x130] sm:$0xff]  ;;  %v1247_v55 = vadd.f32 %v3743_v42, %v1208_v52  ;;  %v1278_v21 = vmax.f32 %v1246_v54, 0.0 }
 0x1a6   : > { %2958 = vmatprep.mubr.bf16.mxu0 %v3180_v20  ;;  %1301 = vst [vmem:[#allocation2 + $0x28] sm:$0xff] %v1269_v14  ;;  %v3769_v15 = vpack.c.bf16 %v1269_v14, %v1268_v13  ;;  %v1239_v20 = vadd.f32 %v3743_v42, %v1200_v19  ;;  %v1215_v13 = vld [vmem:[#allocation2 + $0xc8] sm:$0xff]  ;;  %v1216_v14 = vld [vmem:[#allocation2 + $0x60] sm:$0xff] }
 0x1a7   : > { %v1279_v27 = vmax.f32 %v1247_v55, 0.0  ;;  %1310 = vst [vmem:[#allocation2 + $0x78] sm:$0xff] %v1278_v21  ;;  %v1254_v18 = vadd.f32 %v3743_v42, %v1215_v13  ;;  %v1255_v19 = vadd.f32 %v3743_v42, %v1216_v14 }
 0x1a9   : > { %1311 = vst [vmem:[#allocation2 + $0x88] sm:$0xff] %v1279_v27  ;;  %v3789_v59 = vpack.c.bf16 %v1279_v27, %v1278_v21  ;;  %v1286_v22 = vmax.f32 %v1254_v18, 0.0  ;;  %v3211_v27 = vld [vmem:[%s4038_s8 + $0x30] sm:$0xff]  }
 0x1ab   : > { %1318 = vst [vmem:[#allocation2 + $0xc8] sm:$0xff] %v1286_v22 }
 0x1ad   : > { %2959 = vmatmul.mubr.bf16.gmra.mxu0 %v3181_v32  ;;  %v1271_v32 = vmax.f32 %v1239_v20, 0.0  ;;  %v1287_v20 = vmax.f32 %v1255_v19, 0.0 }
 0x1ae   : > { %2962 = vmatprep.mubr.bf16.mxu0 %v3182_v23 }
 0x1af   : > { %1303 = vst [vmem:[#allocation2 + $0x130] sm:$0xff] %v1271_v32  ;;  %v3773_v23 = vpack.c.bf16 %v1271_v32, %v1270_v26  ;;  %1319 = vst [vmem:[#allocation2 + $0x60] sm:$0xff] %v1287_v20  ;;  %v3805_v26 = vpack.c.bf16 %v1287_v20, %v1286_v22  ;;  %v1217_v32 = vld [vmem:[#allocation2 + $0x1c8] sm:$0xff] }
 0x1b5   : > { %2963 = vmatmul.mubr.bf16.gmra.mxu0 %v3183_v28  ;;  %v1201_v28 = vld [vmem:[#allocation2 + $0x48] sm:$0xff] }
 0x1b6   : > { %2966 = vmatprep.mubr.bf16.mxu0 %v3184_v29  ;;  %v1202_v29 = vld [vmem:[#allocation2 + $0xa8] sm:$0xff] }
 0x1bd   : > { %2967 = vmatmul.mubr.bf16.gmra.mxu0 %v3185_v38  ;;  %v1240_v38 = vadd.f32 %v3743_v42, %v1201_v28  ;;  %v1218_v28 = vld [vmem:[#allocation2] sm:$0xff] }
 0x1be   : > { %2970 = vmatprep.mubr.bf16.mxu0 %v3186_v44  ;;  %v1241_v44 = vadd.f32 %v3743_v42, %v1202_v29  ;;  %v1256_v29 = vadd.f32 %v3743_v42, %v1217_v32 }
 0x1c5   : > { %2971 = vmatmul.mubr.bf16.gmra.mxu0 %v3187_v50  ;;  %v1272_v50 = vmax.f32 %v1240_v38, 0.0  ;;  %v1257_v38 = vadd.f32 %v3743_v42, %v1218_v28 }
 0x1c6   : > { %2974 = vmatprep.mubr.bf16.mxu0 %v3188_v30  ;;  %v1273_v30 = vmax.f32 %v1241_v44, 0.0  ;;  %v1288_v44 = vmax.f32 %v1256_v29, 0.0 }
 0x1c7   : > { %1304 = vst [vmem:[#allocation2 + $0x48] sm:$0xff] %v1272_v50 }
 0x1c8   : > { %1305 = vst [vmem:[#allocation2 + $0xa8] sm:$0xff] %v1273_v30  ;;  %1320 = vst [vmem:[#allocation2 + $0x1c8] sm:$0xff] %v1288_v44 }
 0x1cd   : > { %2975 = vmatmul.mubr.bf16.gmra.mxu0 %v3189_v31  ;;  %v3777_v31 = vpack.c.bf16 %v1273_v30, %v1272_v50  ;;  %v1289_v50 = vmax.f32 %v1257_v38, 0.0 }
 0x1ce   : > { %2978 = vmatprep.mubr.bf16.mxu0 %v3190_v36  ;;  %v1203_v36 = vld [vmem:[#allocation2 + $0x18] sm:$0xff] }
 0x1cf   : > { %1321 = vst [vmem:[#allocation2] sm:$0xff] %v1289_v50  ;;  %v3809_v30 = vpack.c.bf16 %v1289_v50, %v1288_v44 }
 0x1d5   : > { %2979 = vmatmul.mubr.bf16.gmra.mxu0 %v3191_v56  ;;  %v1204_v56 = vld [vmem:[#allocation2 + $0xc0] sm:$0xff] }
 0x1d6   : > { %2982 = vmatprep.mubr.bf16.mxu0 %v3192_v62  ;;  %v1242_v62 = vadd.f32 %v3743_v42, %v1203_v36  ;;  %v3814_v36 = vld [vmem:[%s4035_s5] ss:$0 sm:$0xff] }
 0x1d8   : > { %v1274_v37 = vmax.f32 %v1242_v62, 0.0  ;;  %v1220_v62 = vld [vmem:[#allocation2 + $0x10] sm:$0xff] }
 0x1da   : > { %1306 = vst [vmem:[#allocation2 + $0x18] sm:$0xff] %v1274_v37 }
 0x1dd   : > { %2983 = vmatmul.mubr.bf16.gmra.mxu0 %v3193_v4  ;;  %v1243_v4 = vadd.f32 %v3743_v42, %v1204_v56  ;;  %v1219_v56 = vld [vmem:[#allocation2 + $0x1e0] sm:$0xff] }
 0x1df   : > { %v1275_v40 = vmax.f32 %v1243_v4, 0.0 }
 0x1e1   : > { %1307 = vst [vmem:[#allocation2 + $0xc0] sm:$0xff] %v1275_v40  ;;  %v3781_v41 = vpack.c.bf16 %v1275_v40, %v1274_v37  ;;  %v1258_v37 = vadd.f32 %v3743_v42, %v1219_v56  ;;  %v1259_v40 = vadd.f32 %v3743_v42, %v1220_v62  ;;  %v3210_v42 = vld [vmem:[%s4038_s8 + $0x38] sm:$0xff]  }
 0x1e2   : > { %2986 = vmatprep.subr.bf16.mxu0 %v3210_v42 }
 0x1e3   : > { %v1290_v24 = vmax.f32 %v1258_v37, 0.0  ;;  %v1291_v46 = vmax.f32 %v1259_v40, 0.0  ;;  %2987 = vmatpush3.bf16.msra.mxu0 %v3210_v42 }
 0x1e4   : > { %2988 = vmatprep.subr.bf16.mxu0 %v3211_v27 }
 0x1e5   : > { %1322 = vst [vmem:[#allocation2 + $0x1e0] sm:$0xff] %v1290_v24  ;;  %1323 = vst [vmem:[#allocation2 + $0x10] sm:$0xff] %v1291_v46  ;;  %v3820_v52 = vpack.c.bf16 %v1291_v46, %v1290_v24 }
 0x1e7   : > { %2989 = vmatpush3.bf16.msra.mxu0 %v3211_v27 }
 0x1e8   : > { %2990 = vmatprep.subr.bf16.mxu0 %v3212_v51 }
 0x1eb   : > { %2991 = vmatpush3.bf16.msra.mxu0 %v3212_v51 }
 0x265   : > { %v2956_v4 = vpop.f32.mrf.mxu0 }
 0x266   : > { %v1566_v10 = vadd.f32 %v2956_v4, %v3814_v36 }
 0x267   : > { %v1557_v16 = vpop.f32.mrf.mxu0 }
 0x268   : > { %v1686_v47 = vmax.f32 %v1566_v10, 0.0  ;;  %v1558_v48 = vadd.f32 %v3814_v36, %v1557_v16 }
 0x269   : > { %v2957_v49 = vpop.f32.mrf.mxu0 }
 0x26a   : > { %v1684_v54 = vmax.f32 %v1558_v48, 0.0  ;;  %v1569_v55 = vadd.f32 %v2957_v49, %v3814_v36 }
 0x26b   : > { %v1560_v21 = vpop.f32.mrf.mxu0 }
 0x26c   : > { %v1687_v60 = vmax.f32 %v1569_v55, 0.0  ;;  %v1561_v0 = vadd.f32 %v3814_v36, %v1560_v21 }
 0x26d   : > { %v2960_v33 = vpop.f32.mrf.mxu0 }
 0x26e   : > { %v1685_v39 = vmax.f32 %v1561_v0, 0.0  ;;  %v1582_v45 = vadd.f32 %v2960_v33, %v3814_v36  ;;  %v1815_v35 = vpack.c.bf16 %v1687_v60, %v1686_v47 }
 0x26f   : > { %v1573_v2 = vpop.f32.mrf.mxu0 }
 0x270   : > { %v1690_v57 = vmax.f32 %v1582_v45, 0.0  ;;  %v1574_v63 = vadd.f32 %v3814_v36, %v1573_v2  ;;  %v1813_v6 = vpack.c.bf16 %v1685_v39, %v1684_v54 }
 0x271   : > { %v2961_v5 = vpop.f32.mrf.mxu0 }
 0x272   : > { %v1688_v11 = vmax.f32 %v1574_v63, 0.0  ;;  %v1585_v25 = vadd.f32 %v2961_v5, %v3814_v36  ;;  %2011 = vmatprep.mubr.bf16.mxu1 %v1813_v6 }
 0x273   : > { %v1576_v43 = vpop.f32.mrf.mxu0  ;;  %2012 = vmatmul.mubr.bf16.vlgmr.msra.gmra.mxu1 %v3753_v58 }
 0x274   : > { %v1691_v61 = vmax.f32 %v1585_v25, 0.0  ;;  %v1577_v8 = vadd.f32 %v3814_v36, %v1576_v43  ;;  %2019 = vmatprep.mubr.bf16.mxu1 %v1815_v35 }
 0x275   : > { %v2964_v9 = vpop.f32.mrf.mxu0 }
 0x276   : > { %v1689_v13 = vmax.f32 %v1577_v8, 0.0  ;;  %v1598_v14 = vadd.f32 %v2964_v9, %v3814_v36  ;;  %v1819_v16 = vpack.c.bf16 %v1691_v61, %v1690_v57 }
 0x277   : > { %v1589_v18 = vpop.f32.mrf.mxu0 }
 0x278   : > { %v1694_v19 = vmax.f32 %v1598_v14, 0.0  ;;  %v1590_v22 = vadd.f32 %v3814_v36, %v1589_v18  ;;  %v1817_v20 = vpack.c.bf16 %v1689_v13, %v1688_v11 }
 0x279   : > { %v2965_v32 = vpop.f32.mrf.mxu0 }
 0x27a   : > { %v1692_v28 = vmax.f32 %v1590_v22, 0.0  ;;  %v1601_v29 = vadd.f32 %v2965_v32, %v3814_v36 }
 0x27b   : > { %2020 = vmatmul.mubr.bf16.gmra.mxu1 %v3757_v1  ;;  %v1592_v58 = vpop.f32.mrf.mxu0 }
 0x27c   : > { %v1695_v38 = vmax.f32 %v1601_v29, 0.0  ;;  %2027 = vmatprep.mubr.bf16.mxu1 %v1817_v20  ;;  %v1593_v44 = vadd.f32 %v3814_v36, %v1592_v58 }
 0x27d   : > { %v2968_v50 = vpop.f32.mrf.mxu0 }
 0x27e   : > { %v1693_v56 = vmax.f32 %v1593_v44, 0.0  ;;  %v3844_v62 = vadd.f32 %v2968_v50, %v3814_v36  ;;  %v1823_v35 = vpack.c.bf16 %v1695_v38, %v1694_v19 }
 0x27f   : > { %v1605_v4 = vpop.f32.mrf.mxu0 }
 0x280   : > { %v1698_v37 = vmax.f32 %v3844_v62, 0.0  ;;  %v1606_v40 = vadd.f32 %v3814_v36, %v1605_v4  ;;  %v1821_v42 = vpack.c.bf16 %v1693_v56, %v1692_v28  ;;  %v3213_v62 = vld [vmem:[%s4038_s8 + $0x20] sm:$0xff]  }
 0x281   : > { %v2969_v10 = vpop.f32.mrf.mxu0  ;;  %2992 = vmatprep.subr.bf16.mxu0 %v3213_v62 }
 0x282   : > { %v1696_v24 = vmax.f32 %v1606_v40, 0.0  ;;  %v1617_v1 = vadd.f32 %v2969_v10, %v3814_v36  ;;  %2993 = vmatpush3.bf16.msra.mxu0 %v3213_v62 }
 0x283   : > { %2028 = vmatmul.mubr.bf16.gmra.mxu1 %v3761_v7  ;;  %v1608_v46 = vpop.f32.mrf.mxu0 }
 0x284   : > { %2035 = vmatprep.mubr.bf16.mxu1 %v1819_v16  ;;  %v1699_v47 = vmax.f32 %v1617_v1, 0.0  ;;  %v1609_v48 = vadd.f32 %v3814_v36, %v1608_v46 }
 0x285   : > { %v2972_v49 = vpop.f32.mrf.mxu0 }
 0x286   : > { %v1697_v54 = vmax.f32 %v1609_v48, 0.0  ;;  %v3852_v55 = vadd.f32 %v2972_v49, %v3814_v36  ;;  %v1827_v1 = vpack.c.bf16 %v1699_v47, %v1698_v37 }
 0x287   : > { %v1621_v21 = vpop.f32.mrf.mxu0 }
 0x288   : > { %v1702_v27 = vmax.f32 %v3852_v55, 0.0  ;;  %v1622_v60 = vadd.f32 %v3814_v36, %v1621_v21  ;;  %v1825_v20 = vpack.c.bf16 %v1697_v54, %v1696_v24 }
 0x289   : > { %v2973_v0 = vpop.f32.mrf.mxu0 }
 0x28a   : > { %v1700_v33 = vmax.f32 %v1622_v60, 0.0  ;;  %v1633_v7 = vadd.f32 %v2973_v0, %v3814_v36 }
 0x28b   : > { %2036 = vmatmul.mubr.bf16.gmra.mxu1 %v3765_v53  ;;  %v1624_v39 = vpop.f32.mrf.mxu0 }
 0x28c   : > { %2043 = vmatprep.mubr.bf16.mxu1 %v1821_v42  ;;  %v1703_v45 = vmax.f32 %v1633_v7, 0.0  ;;  %v1625_v2 = vadd.f32 %v3814_v36, %v1624_v39 }
 0x28d   : > { %v2976_v51 = vpop.f32.mrf.mxu0 }
 0x28e   : > { %v1701_v57 = vmax.f32 %v1625_v2, 0.0  ;;  %v3860_v63 = vadd.f32 %v2976_v51, %v3814_v36  ;;  %v1831_v42 = vpack.c.bf16 %v1703_v45, %v1702_v27 }
 0x28f   : > { %v1637_v6 = vpop.f32.mrf.mxu0 }
 0x290   : > { %v1706_v5 = vmax.f32 %v3860_v63, 0.0  ;;  %v1638_v11 = vadd.f32 %v3814_v36, %v1637_v6  ;;  %v1829_v21 = vpack.c.bf16 %v1701_v57, %v1700_v33 }
 0x291   : > { %v2977_v25 = vpop.f32.mrf.mxu0 }
 0x292   : > { %v1704_v43 = vmax.f32 %v1638_v11, 0.0  ;;  %v1649_v53 = vadd.f32 %v2977_v25, %v3814_v36 }
 0x293   : > { %2044 = vmatmul.mubr.bf16.gmra.mxu1 %v3769_v15  ;;  %v1640_v61 = vpop.f32.mrf.mxu0 }
 0x294   : > { %2051 = vmatprep.mubr.bf16.mxu1 %v1823_v35  ;;  %v1707_v8 = vmax.f32 %v1649_v53, 0.0  ;;  %v1641_v9 = vadd.f32 %v3814_v36, %v1640_v61 }
 0x295   : > { %v2980_v13 = vpop.f32.mrf.mxu0 }
 0x296   : > { %v1705_v14 = vmax.f32 %v1641_v9, 0.0  ;;  %v1662_v18 = vadd.f32 %v2980_v13, %v3814_v36  ;;  %v1835_v37 = vpack.c.bf16 %v1707_v8, %v1706_v5 }
 0x297   : > { %v1653_v22 = vpop.f32.mrf.mxu0 }
 0x298   : > { %v1710_v32 = vmax.f32 %v1662_v18, 0.0  ;;  %v1654_v28 = vadd.f32 %v3814_v36, %v1653_v22 }
 0x299   : > { %v2981_v19 = vpop.f32.mrf.mxu0 }
 0x29a   : > { %v1708_v29 = vmax.f32 %v1654_v28, 0.0  ;;  %v1665_v58 = vadd.f32 %v2981_v19, %v3814_v36 }
 0x29b   : > { %2052 = vmatmul.mubr.bf16.gmra.mxu1 %v3773_v23  ;;  %v1656_v15 = vpop.f32.mrf.mxu0 }
 0x29c   : > { %2059 = vmatprep.mubr.bf16.mxu1 %v1825_v20  ;;  %v1711_v38 = vmax.f32 %v1665_v58, 0.0  ;;  %v1657_v44 = vadd.f32 %v3814_v36, %v1656_v15 }
 0x29d   : > { %v2984_v50 = vpop.f32.mrf.mxu0 }
 0x29e   : > { %v1709_v56 = vmax.f32 %v1657_v44, 0.0  ;;  %v1678_v4 = vadd.f32 %v2984_v50, %v3814_v36  ;;  %v1839_v27 = vpack.c.bf16 %v1711_v38, %v1710_v32 }
 0x29f   : > { %v1669_v40 = vpop.f32.mrf.mxu0 }
 0x2a0   : > { %v1714_v10 = vmax.f32 %v1678_v4, 0.0  ;;  %v1670_v16 = vadd.f32 %v3814_v36, %v1669_v40  ;;  %v1837_v47 = vpack.c.bf16 %v1709_v56, %v1708_v29 }
 0x2a1   : > { %v2985_v24 = vpop.f32.mrf.mxu0 }
 0x2a2   : > { %v1712_v46 = vmax.f32 %v1670_v16, 0.0  ;;  %v1681_v23 = vadd.f32 %v2985_v24, %v3814_v36 }
 0x2a3   : > { %2060 = vmatmul.mubr.bf16.gmra.mxu1 %v3777_v31  ;;  %v1672_v48 = vpop.f32.mrf.mxu0  ;;  %v1833_v31 = vpack.c.bf16 %v1705_v14, %v1704_v43 }
 0x2a4   : > { %2067 = vmatprep.mubr.bf16.mxu1 %v1827_v1  ;;  %v1715_v49 = vmax.f32 %v1681_v23, 0.0  ;;  %v1673_v54 = vadd.f32 %v3814_v36, %v1672_v48  ;;  %v3214_v36 = vld [vmem:[%s4038_s8 + $0x18] sm:$0xff]  }
 0x2a5   : > { %2994 = vmatprep.subr.bf16.mxu0 %v3214_v36 }
 0x2a6   : > { %v1713_v55 = vmax.f32 %v1673_v54, 0.0  ;;  %2995 = vmatpush3.bf16.msra.mxu0 %v3214_v36 }
 0x2a8   : > { %v1841_v60 = vpack.c.bf16 %v1713_v55, %v1712_v46 }
 0x2ab   : > { %2068 = vmatmul.mubr.bf16.gmra.mxu1 %v3781_v41  ;;  %v3215_v41 = vld [vmem:[%s4038_s8 + $0x10] sm:$0xff]  }
 0x2ac   : > { %2075 = vmatprep.mubr.bf16.mxu1 %v1829_v21  ;;  %2996 = vmatprep.subr.bf16.mxu0 %v3215_v41 }
 0x2ad   : > { %2997 = vmatpush3.bf16.msra.mxu0 %v3215_v41 }
 0x2b3   : > { %2076 = vmatmul.mubr.bf16.gmra.mxu1 %v3785_v34  ;;  %v3216_v34 = vld [vmem:[%s4038_s8 + $0x8] sm:$0xff]  }
 0x2b4   : > { %2083 = vmatprep.mubr.bf16.mxu1 %v1831_v42  ;;  %2998 = vmatprep.subr.bf16.mxu0 %v3216_v34 }
 0x2b5   : > { %2999 = vmatpush3.bf16.msra.mxu0 %v3216_v34 }
 0x2bb   : > { %2084 = vmatmul.mubr.bf16.gmra.mxu1 %v3789_v59  ;;  %v3217_v59 = vld [vmem:[%s4038_s8] sm:$0xff]  }
 0x2bc   : > { %2091 = vmatprep.mubr.bf16.mxu1 %v1833_v31  ;;  %3000 = vmatprep.subr.bf16.mxu0 %v3217_v59 }
 0x2bd   : > { %3001 = vmatpush3.bf16.msra.mxu0 %v3217_v59 }
 0x2c3   : > { %2092 = vmatmul.mubr.bf16.gmra.mxu1 %v3793_v3  ;;  %v1843_v3 = vpack.c.bf16 %v1715_v49, %v1714_v10 }
 0x2c4   : > { %2099 = vmatprep.mubr.bf16.mxu1 %v1835_v37 }
 0x2cb   : > { %2100 = vmatmul.mubr.bf16.gmra.mxu1 %v3797_v17  ;;  %v3906_v17 = vld [vmem:[%s4037_s7] ss:$0 sm:$0xff] }
 0x2cc   : > { %2107 = vmatprep.mubr.bf16.mxu1 %v1837_v47 }
 0x2d3   : > { %2108 = vmatmul.mubr.bf16.gmra.mxu1 %v3801_v12 }
 0x2d4   : > { %2115 = vmatprep.mubr.bf16.mxu1 %v1839_v27 }
 0x2db   : > { %2116 = vmatmul.mubr.bf16.gmra.mxu1 %v3805_v26 }
 0x2dc   : > { %2123 = vmatprep.mubr.bf16.mxu1 %v1841_v60 }
 0x2e3   : > { %2124 = vmatmul.mubr.bf16.gmra.mxu1 %v3809_v30 }
 0x2e4   : > { %2131 = vmatprep.mubr.bf16.mxu1 %v1843_v3 }
 0x2eb   : > { %2132 = vmatmul.mubr.bf16.gmra.mxu1 %v3820_v52 }
 0x333   : > { %v2818_v0 = vpop.f32.mrf.mxu1 }
 0x335   : > { %v2819_v33 = vpop.f32.mrf.mxu1 }
 0x336   : > { %v2820_v7 = vadd.f32 %v2819_v33, %v2818_v0 }
 0x337   : > { %v2821_v12 = vpop.f32.mrf.mxu1 }
 0x338   : > { %v2014_v45 = vadd.f32 %v2820_v7, %v3906_v17 }
 0x339   : > { %v2822_v39 = vpop.f32.mrf.mxu1 }
 0x33a   : > { %v2823_v26 = vadd.f32 %v2822_v39, %v2821_v12  ;;  %v2140_v57 = vmax.f32 %v2014_v45, 0.0 }
 0x33b   : > { %v2824_v2 = vpop.f32.mrf.mxu1 }
 0x33c   : > { %v2017_v51 = vadd.f32 %v2823_v26, %v3906_v17 }
 0x33d   : > { %v2825_v30 = vpop.f32.mrf.mxu1 }
 0x33e   : > { %v2141_v63 = vmax.f32 %v2017_v51, 0.0  ;;  %v2826_v52 = vadd.f32 %v2825_v30, %v2824_v2 }
 0x33f   : > { %v2827_v6 = vpop.f32.mrf.mxu1 }
 0x340   : > { %v2172_v5 = vpack.c.bf16 %v2141_v63, %v2140_v57  ;;  %v2022_v25 = vadd.f32 %v2826_v52, %v3906_v17 }
 0x341   : > { %v2828_v11 = vpop.f32.mrf.mxu1 }
 0x342   : > { %v2829_v35 = vadd.f32 %v2828_v11, %v2827_v6  ;;  %3002 = vmatprep.mubr.bf16.mxu0 %v2172_v5  ;;  %v2142_v8 = vmax.f32 %v2022_v25, 0.0 }
 0x343   : > { %v2830_v43 = vpop.f32.mrf.mxu1 }
 0x344   : > { %v2025_v53 = vadd.f32 %v2829_v35, %v3906_v17 }
 0x345   : > { %v2831_v61 = vpop.f32.mrf.mxu1 }
 0x346   : > { %v2143_v9 = vmax.f32 %v2025_v53, 0.0  ;;  %v2832_v13 = vadd.f32 %v2831_v61, %v2830_v43 }
 0x347   : > { %v2833_v14 = vpop.f32.mrf.mxu1 }
 0x348   : > { %v2173_v18 = vpack.c.bf16 %v2143_v9, %v2142_v8  ;;  %v2030_v20 = vadd.f32 %v2832_v13, %v3906_v17 }
 0x349   : > { %v2834_v22 = vpop.f32.mrf.mxu1 }
 0x34a   : > { %v2835_v32 = vadd.f32 %v2834_v22, %v2833_v14  ;;  %3003 = vmatmul.mubr.bf16.vlgmr.msra.gmra.mxu0 %v2173_v18  ;;  %v2144_v58 = vmax.f32 %v2030_v20, 0.0 }
 0x34b   : > { %v2836_v28 = vpop.f32.mrf.mxu1 }
 0x34c   : > { %v2033_v19 = vadd.f32 %v2835_v32, %v3906_v17 }
 0x34d   : > { %v2837_v29 = vpop.f32.mrf.mxu1 }
 0x34e   : > { %v2145_v15 = vmax.f32 %v2033_v19, 0.0  ;;  %v2838_v38 = vadd.f32 %v2837_v29, %v2836_v28 }
 0x34f   : > { %v2839_v44 = vpop.f32.mrf.mxu1 }
 0x350   : > { %v2174_v50 = vpack.c.bf16 %v2145_v15, %v2144_v58  ;;  %v2038_v4 = vadd.f32 %v2838_v38, %v3906_v17 }
 0x351   : > { %v2840_v56 = vpop.f32.mrf.mxu1 }
 0x352   : > { %v2841_v40 = vadd.f32 %v2840_v56, %v2839_v44  ;;  %3006 = vmatprep.mubr.bf16.mxu0 %v2174_v50  ;;  %v2146_v1 = vmax.f32 %v2038_v4, 0.0 }
 0x353   : > { %v2842_v10 = vpop.f32.mrf.mxu1 }
 0x354   : > { %v2041_v16 = vadd.f32 %v2841_v40, %v3906_v17 }
 0x355   : > { %v2843_v24 = vpop.f32.mrf.mxu1 }
 0x356   : > { %v2147_v46 = vmax.f32 %v2041_v16, 0.0  ;;  %v2844_v23 = vadd.f32 %v2843_v24, %v2842_v10 }
 0x357   : > { %v2845_v48 = vpop.f32.mrf.mxu1 }
 0x358   : > { %v2175_v49 = vpack.c.bf16 %v2147_v46, %v2146_v1  ;;  %v2046_v55 = vadd.f32 %v2844_v23, %v3906_v17 }
 0x359   : > { %v2846_v54 = vpop.f32.mrf.mxu1 }
 0x35a   : > { %v2847_v21 = vadd.f32 %v2846_v54, %v2845_v48  ;;  %3007 = vmatmul.mubr.bf16.gmra.mxu0 %v2175_v49  ;;  %v2148_v36 = vmax.f32 %v2046_v55, 0.0 }
 0x35b   : > { %v2848_v42 = vpop.f32.mrf.mxu1 }
 0x35c   : > { %v2049_v62 = vadd.f32 %v2847_v21, %v3906_v17 }
 0x35d   : > { %v2849_v31 = vpop.f32.mrf.mxu1 }
 0x35e   : > { %v2149_v41 = vmax.f32 %v2049_v62, 0.0  ;;  %v2850_v34 = vadd.f32 %v2849_v31, %v2848_v42 }
 0x35f   : > { %v2851_v37 = vpop.f32.mrf.mxu1 }
 0x360   : > { %v2176_v59 = vpack.c.bf16 %v2149_v41, %v2148_v36  ;;  %v2054_v27 = vadd.f32 %v2850_v34, %v3906_v17 }
 0x361   : > { %v2852_v47 = vpop.f32.mrf.mxu1 }
 0x362   : > { %v2853_v60 = vadd.f32 %v2852_v47, %v2851_v37  ;;  %3010 = vmatprep.mubr.bf16.mxu0 %v2176_v59  ;;  %v2150_v7 = vmax.f32 %v2054_v27, 0.0 }
 0x363   : > { %v2854_v3 = vpop.f32.mrf.mxu1 }
 0x364   : > { %v2057_v0 = vadd.f32 %v2853_v60, %v3906_v17 }
 0x365   : > { %v2855_v33 = vpop.f32.mrf.mxu1 }
 0x366   : > { %v2151_v12 = vmax.f32 %v2057_v0, 0.0  ;;  %v2856_v39 = vadd.f32 %v2855_v33, %v2854_v3 }
 0x367   : > { %v2857_v45 = vpop.f32.mrf.mxu1 }
 0x368   : > { %v2177_v26 = vpack.c.bf16 %v2151_v12, %v2150_v7  ;;  %v2062_v51 = vadd.f32 %v2856_v39, %v3906_v17 }
 0x369   : > { %v2858_v2 = vpop.f32.mrf.mxu1 }
 0x36a   : > { %v2859_v30 = vadd.f32 %v2858_v2, %v2857_v45  ;;  %3011 = vmatmul.mubr.bf16.gmra.mxu0 %v2177_v26  ;;  %v2152_v6 = vmax.f32 %v2062_v51, 0.0 }
 0x36b   : > { %v2860_v57 = vpop.f32.mrf.mxu1 }
 0x36c   : > { %v2065_v63 = vadd.f32 %v2859_v30, %v3906_v17 }
 0x36d   : > { %v2861_v52 = vpop.f32.mrf.mxu1 }
 0x36e   : > { %v2153_v5 = vmax.f32 %v2065_v63, 0.0  ;;  %v2862_v11 = vadd.f32 %v2861_v52, %v2860_v57 }
 0x36f   : > { %v2863_v25 = vpop.f32.mrf.mxu1 }
 0x370   : > { %v2178_v35 = vpack.c.bf16 %v2153_v5, %v2152_v6  ;;  %v2070_v53 = vadd.f32 %v2862_v11, %v3906_v17 }
 0x371   : > { %v2864_v43 = vpop.f32.mrf.mxu1 }
 0x372   : > { %v2865_v61 = vadd.f32 %v2864_v43, %v2863_v25  ;;  %3014 = vmatprep.mubr.bf16.mxu0 %v2178_v35  ;;  %v2154_v14 = vmax.f32 %v2070_v53, 0.0 }
 0x373   : > { %v2866_v8 = vpop.f32.mrf.mxu1 }
 0x374   : > { %v2073_v9 = vadd.f32 %v2865_v61, %v3906_v17 }
 0x375   : > { %v2867_v13 = vpop.f32.mrf.mxu1 }
 0x376   : > { %v2155_v18 = vmax.f32 %v2073_v9, 0.0  ;;  %v2868_v22 = vadd.f32 %v2867_v13, %v2866_v8 }
 0x377   : > { %v2869_v20 = vpop.f32.mrf.mxu1 }
 0x378   : > { %v2179_v32 = vpack.c.bf16 %v2155_v18, %v2154_v14  ;;  %v2078_v19 = vadd.f32 %v2868_v22, %v3906_v17 }
 0x379   : > { %v2870_v28 = vpop.f32.mrf.mxu1 }
 0x37a   : > { %v2871_v29 = vadd.f32 %v2870_v28, %v2869_v20  ;;  %3015 = vmatmul.mubr.bf16.gmra.mxu0 %v2179_v32  ;;  %v2156_v44 = vmax.f32 %v2078_v19, 0.0 }
 0x37b   : > { %v2872_v58 = vpop.f32.mrf.mxu1 }
 0x37c   : > { %v2081_v15 = vadd.f32 %v2871_v29, %v3906_v17 }
 0x37d   : > { %v2873_v38 = vpop.f32.mrf.mxu1 }
 0x37e   : > { %v2157_v50 = vmax.f32 %v2081_v15, 0.0  ;;  %v2874_v56 = vadd.f32 %v2873_v38, %v2872_v58 }
 0x37f   : > { %v2875_v4 = vpop.f32.mrf.mxu1 }
 0x380   : > { %v2180_v40 = vpack.c.bf16 %v2157_v50, %v2156_v44  ;;  %v2086_v16 = vadd.f32 %v2874_v56, %v3906_v17 }
 0x381   : > { %v2876_v10 = vpop.f32.mrf.mxu1 }
 0x382   : > { %v2877_v24 = vadd.f32 %v2876_v10, %v2875_v4  ;;  %3018 = vmatprep.mubr.bf16.mxu0 %v2180_v40  ;;  %v2158_v48 = vmax.f32 %v2086_v16, 0.0 }
 0x383   : > { %v2878_v1 = vpop.f32.mrf.mxu1 }
 0x384   : > { %v2089_v46 = vadd.f32 %v2877_v24, %v3906_v17 }
 0x385   : > { %v2879_v23 = vpop.f32.mrf.mxu1 }
 0x386   : > { %v2159_v49 = vmax.f32 %v2089_v46, 0.0  ;;  %v2880_v54 = vadd.f32 %v2879_v23, %v2878_v1 }
 0x387   : > { %v2881_v55 = vpop.f32.mrf.mxu1 }
 0x388   : > { %v2181_v21 = vpack.c.bf16 %v2159_v49, %v2158_v48  ;;  %v2094_v62 = vadd.f32 %v2880_v54, %v3906_v17 }
 0x389   : > { %v2882_v42 = vpop.f32.mrf.mxu1 }
 0x38a   : > { %v2883_v31 = vadd.f32 %v2882_v42, %v2881_v55  ;;  %3019 = vmatmul.mubr.bf16.gmra.mxu0 %v2181_v21  ;;  %v2160_v37 = vmax.f32 %v2094_v62, 0.0  ;;  %v3943_v21 = vld [vmem:[%s4039_s9] ss:$0 sm:$0xff] }
 0x38b   : > { %v2884_v36 = vpop.f32.mrf.mxu1 }
 0x38c   : > { %v2097_v41 = vadd.f32 %v2883_v31, %v3906_v17 }
 0x38d   : > { %v2885_v34 = vpop.f32.mrf.mxu1 }
 0x38e   : > { %v2161_v59 = vmax.f32 %v2097_v41, 0.0  ;;  %v2886_v47 = vadd.f32 %v2885_v34, %v2884_v36 }
 0x38f   : > { %v2887_v27 = vpop.f32.mrf.mxu1 }
 0x390   : > { %v2182_v60 = vpack.c.bf16 %v2161_v59, %v2160_v37  ;;  %v2102_v0 = vadd.f32 %v2886_v47, %v3906_v17 }
 0x391   : > { %v2888_v3 = vpop.f32.mrf.mxu1 }
 0x392   : > { %v2889_v33 = vadd.f32 %v2888_v3, %v2887_v27  ;;  %3022 = vmatprep.mubr.bf16.mxu0 %v2182_v60  ;;  %v2162_v45 = vmax.f32 %v2102_v0, 0.0 }
 0x393   : > { %v2890_v7 = vpop.f32.mrf.mxu1 }
 0x394   : > { %v2105_v12 = vadd.f32 %v2889_v33, %v3906_v17 }
 0x395   : > { %v2891_v39 = vpop.f32.mrf.mxu1 }
 0x396   : > { %v2163_v26 = vmax.f32 %v2105_v12, 0.0  ;;  %v2892_v2 = vadd.f32 %v2891_v39, %v2890_v7 }
 0x397   : > { %v2893_v51 = vpop.f32.mrf.mxu1 }
 0x398   : > { %v2183_v30 = vpack.c.bf16 %v2163_v26, %v2162_v45  ;;  %v2110_v63 = vadd.f32 %v2892_v2, %v3906_v17 }
 0x399   : > { %v2894_v57 = vpop.f32.mrf.mxu1 }
 0x39a   : > { %v2895_v52 = vadd.f32 %v2894_v57, %v2893_v51  ;;  %3023 = vmatmul.mubr.bf16.gmra.mxu0 %v2183_v30  ;;  %v2164_v25 = vmax.f32 %v2110_v63, 0.0 }
 0x39b   : > { %v2896_v6 = vpop.f32.mrf.mxu1 }
 0x39c   : > { %v2113_v5 = vadd.f32 %v2895_v52, %v3906_v17 }
 0x39d   : > { %v2897_v11 = vpop.f32.mrf.mxu1 }
 0x39e   : > { %v2165_v35 = vmax.f32 %v2113_v5, 0.0  ;;  %v2898_v43 = vadd.f32 %v2897_v11, %v2896_v6 }
 0x39f   : > { %v2899_v53 = vpop.f32.mrf.mxu1 }
 0x3a0   : > { %v2184_v61 = vpack.c.bf16 %v2165_v35, %v2164_v25  ;;  %v2118_v9 = vadd.f32 %v2898_v43, %v3906_v17 }
 0x3a1   : > { %v2900_v8 = vpop.f32.mrf.mxu1 }
 0x3a2   : > { %v2901_v13 = vadd.f32 %v2900_v8, %v2899_v53  ;;  %3026 = vmatprep.mubr.bf16.mxu0 %v2184_v61  ;;  %v2166_v20 = vmax.f32 %v2118_v9, 0.0 }
 0x3a3   : > { %v2902_v14 = vpop.f32.mrf.mxu1 }
 0x3a4   : > { %v2121_v18 = vadd.f32 %v2901_v13, %v3906_v17 }
 0x3a5   : > { %v2903_v22 = vpop.f32.mrf.mxu1 }
 0x3a6   : > { %v2167_v32 = vmax.f32 %v2121_v18, 0.0  ;;  %v2904_v28 = vadd.f32 %v2903_v22, %v2902_v14 }
 0x3a7   : > { %v2905_v19 = vpop.f32.mrf.mxu1 }
 0x3a8   : > { %v2185_v29 = vpack.c.bf16 %v2167_v32, %v2166_v20  ;;  %v2126_v15 = vadd.f32 %v2904_v28, %v3906_v17 }
 0x3a9   : > { %v2906_v58 = vpop.f32.mrf.mxu1 }
 0x3aa   : > { %v2907_v38 = vadd.f32 %v2906_v58, %v2905_v19  ;;  %3027 = vmatmul.mubr.bf16.gmra.mxu0 %v2185_v29  ;;  %v2168_v4 = vmax.f32 %v2126_v15, 0.0 }
 0x3ab   : > { %v2908_v44 = vpop.f32.mrf.mxu1 }
 0x3ac   : > { %v2129_v50 = vadd.f32 %v2907_v38, %v3906_v17 }
 0x3ad   : > { %v2909_v56 = vpop.f32.mrf.mxu1 }
 0x3ae   : > { %v2169_v40 = vmax.f32 %v2129_v50, 0.0  ;;  %v2910_v10 = vadd.f32 %v2909_v56, %v2908_v44 }
 0x3af   : > { %v2911_v16 = vpop.f32.mrf.mxu1 }
 0x3b0   : > { %v2186_v24 = vpack.c.bf16 %v2169_v40, %v2168_v4  ;;  %v2134_v46 = vadd.f32 %v2910_v10, %v3906_v17 }
 0x3b1   : > { %v2912_v1 = vpop.f32.mrf.mxu1 }
 0x3b2   : > { %v2913_v23 = vadd.f32 %v2912_v1, %v2911_v16  ;;  %3030 = vmatprep.mubr.bf16.mxu0 %v2186_v24  ;;  %v2170_v49 = vmax.f32 %v2134_v46, 0.0 }
 0x3b4   : > { %v2137_v48 = vadd.f32 %v2913_v23, %v3906_v17 }
 0x3b6   : > { %v2171_v54 = vmax.f32 %v2137_v48, 0.0 }
 0x3b8   : > { %v2187_v55 = vpack.c.bf16 %v2171_v54, %v2170_v49 }
 0x3ba   : > { %3031 = vmatmul.mubr.bf16.gmra.mxu0 %v2187_v55 }
 0x40a   : > { %v3004_v42 = vpop.f32.mrf.mxu0 }
 0x40b   : > { %v2302_v62 = vadd.f32 %v3004_v42, %v3943_v21 }
 0x40c   : > { %v2293_v31 = vpop.f32.mrf.mxu0 }
 0x40d   : > { %2422 = vst [vmem:[%s3474_s24 + $0x10] sm:$0xff] %v2302_v62  ;;  %v2294_v36 = vadd.f32 %v3943_v21, %v2293_v31 }
 0x40e   : > { %v3005_v17 = vpop.f32.mrf.mxu0 }
 0x40f   : > { %2420 = vst [vmem:[%s3474_s24] sm:$0xff] %v2294_v36  ;;  %v2305_v41 = vadd.f32 %v3005_v17, %v3943_v21 }
 0x410   : > { %v2296_v34 = vpop.f32.mrf.mxu0 }
 0x411   : > { %2423 = vst [vmem:[%s3474_s24 + $0x18] sm:$0xff] %v2305_v41  ;;  %v2297_v37 = vadd.f32 %v3943_v21, %v2296_v34 }
 0x413   : > { %2421 = vst [vmem:[%s3474_s24 + $0x8] sm:$0xff] %v2297_v37 }
 0x41a   : > { %v3008_v59 = vpop.f32.mrf.mxu0 }
 0x41b   : > { %v2318_v47 = vadd.f32 %v3008_v59, %v3943_v21 }
 0x41c   : > { %v2309_v27 = vpop.f32.mrf.mxu0 }
 0x41d   : > { %2426 = vst [vmem:[%s3474_s24 + $0x30] sm:$0xff] %v2318_v47  ;;  %v2310_v60 = vadd.f32 %v3943_v21, %v2309_v27 }
 0x41e   : > { %v3009_v3 = vpop.f32.mrf.mxu0 }
 0x41f   : > { %2424 = vst [vmem:[%s3474_s24 + $0x20] sm:$0xff] %v2310_v60  ;;  %v2321_v0 = vadd.f32 %v3009_v3, %v3943_v21 }
 0x420   : > { %v2312_v33 = vpop.f32.mrf.mxu0 }
 0x421   : > { %2427 = vst [vmem:[%s3474_s24 + $0x38] sm:$0xff] %v2321_v0  ;;  %v2313_v7 = vadd.f32 %v3943_v21, %v2312_v33 }
 0x423   : > { %2425 = vst [vmem:[%s3474_s24 + $0x28] sm:$0xff] %v2313_v7 }
 0x42a   : > { %v3012_v12 = vpop.f32.mrf.mxu0 }
 0x42b   : > { %v2334_v39 = vadd.f32 %v3012_v12, %v3943_v21 }
 0x42c   : > { %v2325_v45 = vpop.f32.mrf.mxu0 }
 0x42d   : > { %2430 = vst [vmem:[%s3474_s24 + $0x50] sm:$0xff] %v2334_v39  ;;  %v2326_v26 = vadd.f32 %v3943_v21, %v2325_v45 }
 0x42e   : > { %v3013_v2 = vpop.f32.mrf.mxu0 }
 0x42f   : > { %2428 = vst [vmem:[%s3474_s24 + $0x40] sm:$0xff] %v2326_v26  ;;  %v2337_v51 = vadd.f32 %v3013_v2, %v3943_v21 }
 0x430   : > { %v2328_v30 = vpop.f32.mrf.mxu0 }
 0x431   : > { %2431 = vst [vmem:[%s3474_s24 + $0x58] sm:$0xff] %v2337_v51  ;;  %v2329_v57 = vadd.f32 %v3943_v21, %v2328_v30 }
 0x433   : > { %2429 = vst [vmem:[%s3474_s24 + $0x48] sm:$0xff] %v2329_v57 }
 0x43a   : > { %v3016_v63 = vpop.f32.mrf.mxu0 }
 0x43b   : > { %v2350_v52 = vadd.f32 %v3016_v63, %v3943_v21 }
 0x43c   : > { %v2341_v6 = vpop.f32.mrf.mxu0 }
 0x43d   : > { %2434 = vst [vmem:[%s3474_s24 + $0x70] sm:$0xff] %v2350_v52  ;;  %v2342_v5 = vadd.f32 %v3943_v21, %v2341_v6 }
 0x43e   : > { %v3017_v11 = vpop.f32.mrf.mxu0 }
 0x43f   : > { %2432 = vst [vmem:[%s3474_s24 + $0x60] sm:$0xff] %v2342_v5  ;;  %v2353_v25 = vadd.f32 %v3017_v11, %v3943_v21 }
 0x440   : > { %v2344_v35 = vpop.f32.mrf.mxu0 }
 0x441   : > { %2435 = vst [vmem:[%s3474_s24 + $0x78] sm:$0xff] %v2353_v25  ;;  %v2345_v43 = vadd.f32 %v3943_v21, %v2344_v35 }
 0x443   : > { %2433 = vst [vmem:[%s3474_s24 + $0x68] sm:$0xff] %v2345_v43 }
 0x44a   : > { %v3020_v53 = vpop.f32.mrf.mxu0 }
 0x44b   : > { %v2366_v61 = vadd.f32 %v3020_v53, %v3943_v21 }
 0x44c   : > { %v2357_v8 = vpop.f32.mrf.mxu0 }
 0x44d   : > { %2438 = vst [vmem:[%s3474_s24 + $0x90] sm:$0xff] %v2366_v61  ;;  %v2358_v9 = vadd.f32 %v3943_v21, %v2357_v8 }
 0x44e   : > { %v3021_v13 = vpop.f32.mrf.mxu0 }
 0x44f   : > { %2436 = vst [vmem:[%s3474_s24 + $0x80] sm:$0xff] %v2358_v9  ;;  %v2369_v14 = vadd.f32 %v3021_v13, %v3943_v21 }
 0x450   : > { %v2360_v18 = vpop.f32.mrf.mxu0 }
 0x451   : > { %2439 = vst [vmem:[%s3474_s24 + $0x98] sm:$0xff] %v2369_v14  ;;  %v2361_v22 = vadd.f32 %v3943_v21, %v2360_v18 }
 0x453   : > { %2437 = vst [vmem:[%s3474_s24 + $0x88] sm:$0xff] %v2361_v22 }
 0x45a   : > { %v3024_v20 = vpop.f32.mrf.mxu0 }
 0x45b   : > { %v2382_v32 = vadd.f32 %v3024_v20, %v3943_v21 }
 0x45c   : > { %v2373_v28 = vpop.f32.mrf.mxu0 }
 0x45d   : > { %2442 = vst [vmem:[%s3474_s24 + $0xb0] sm:$0xff] %v2382_v32  ;;  %v2374_v19 = vadd.f32 %v3943_v21, %v2373_v28 }
 0x45e   : > { %v3025_v29 = vpop.f32.mrf.mxu0 }
 0x45f   : > { %2440 = vst [vmem:[%s3474_s24 + $0xa0] sm:$0xff] %v2374_v19  ;;  %v2385_v58 = vadd.f32 %v3025_v29, %v3943_v21 }
 0x460   : > { %v2376_v15 = vpop.f32.mrf.mxu0 }
 0x461   : > { %2443 = vst [vmem:[%s3474_s24 + $0xb8] sm:$0xff] %v2385_v58  ;;  %v2377_v38 = vadd.f32 %v3943_v21, %v2376_v15 }
 0x463   : > { %2441 = vst [vmem:[%s3474_s24 + $0xa8] sm:$0xff] %v2377_v38 }
 0x46a   : > { %v3028_v44 = vpop.f32.mrf.mxu0 }
 0x46b   : > { %v2398_v50 = vadd.f32 %v3028_v44, %v3943_v21 }
 0x46c   : > { %v2389_v56 = vpop.f32.mrf.mxu0 }
 0x46d   : > { %2446 = vst [vmem:[%s3474_s24 + $0xd0] sm:$0xff] %v2398_v50  ;;  %v2390_v4 = vadd.f32 %v3943_v21, %v2389_v56 }
 0x46e   : > { %v3029_v40 = vpop.f32.mrf.mxu0 }
 0x46f   : > { %2444 = vst [vmem:[%s3474_s24 + $0xc0] sm:$0xff] %v2390_v4  ;;  %v2401_v10 = vadd.f32 %v3029_v40, %v3943_v21 }
 0x470   : > { %v2392_v16 = vpop.f32.mrf.mxu0 }
 0x471   : > { %2447 = vst [vmem:[%s3474_s24 + $0xd8] sm:$0xff] %v2401_v10  ;;  %v2393_v24 = vadd.f32 %v3943_v21, %v2392_v16 }
 0x473   : > { %2445 = vst [vmem:[%s3474_s24 + $0xc8] sm:$0xff] %v2393_v24 }
 0x47a   : > { %v3032_v1 = vpop.f32.mrf.mxu0 }
 0x47b   : > { %v2414_v46 = vadd.f32 %v3032_v1, %v3943_v21 }
 0x47c   : > { %v2405_v23 = vpop.f32.mrf.mxu0 }
 0x47d   : > { %2450 = vst [vmem:[%s3474_s24 + $0xf0] sm:$0xff] %v2414_v46  ;;  %v2406_v48 = vadd.f32 %v3943_v21, %v2405_v23 }
 0x47e   : > { %v3033_v49 = vpop.f32.mrf.mxu0 }
 0x47f   : > { %2448 = vst [vmem:[%s3474_s24 + $0xe0] sm:$0xff] %v2406_v48  ;;  %v2417_v54 = vadd.f32 %v3033_v49, %v3943_v21 }
 0x480   : > { %v2408_v55 = vpop.f32.mrf.mxu0 }
 0x481   : > { %2451 = vst [vmem:[%s3474_s24 + $0xf8] sm:$0xff] %v2417_v54  ;;  %v2409_v42 = vadd.f32 %v3943_v21, %v2408_v55 }
 0x483   : > { %2449 = vst [vmem:[%s3474_s24 + $0xe8] sm:$0xff] %v2409_v42 }
 0x484 PF: > { %s20_s19 = sadd.s32 1, %s3272_s19   ;;  %s4045_s11 = sld [smem:[#allocation4_spill]] }
 0x485   : > { %p17_p0 = scmp.ge.s32.totalorder %s20_s19, 6   ;;  %s4046_s12 = sld [smem:[#allocation5_spill]] }
 0x486   : > { %s4047_s13 = smov %s3252_s14  ;;  %s4048_s14 = smov %s3380_s26 }
 0x487   : > { %s4049_s15 = smov %s3264_s17  ;;  %s4050_s16 = smov %s3268_s18 }
 0x488   :  { %19 = sbr.rel (!%p17_p0) target bundleno = 4 (0x4), region = 149 }
 0x48a   : > { %s4051_s17 = smov %s4045_s11 }
 0x48b   : > { %s4052_s18 = smov %s4046_s12 }

</bundles_post_ra>
